<compile_context>
chip_gen: v7x
topology: tpu7x:2x2x1
jax: 0.10.0
libtpu: 0.0.40
codegen_flags: <defaults>
</compile_context>

<pallas_src>
import math
import functools

import jax
import jax.numpy as jnp
from jax import lax
from jax.experimental import pallas as pl
from jax.experimental.pallas import tpu as pltpu

_INV_SQRT2 = 0.7071067811865476


def _layer_norm(x, gamma, beta, eps=1e-5):
    x = x.astype(jnp.float32)
    mean = jnp.mean(x, axis=-1, keepdims=True)
    var = jnp.mean((x - mean) ** 2, axis=-1, keepdims=True)    # biased, like torch LN
    return ((x - mean) * lax.rsqrt(var + eps)
            * gamma.astype(jnp.float32) + beta.astype(jnp.float32))


def transformer_block_kernel(xq_ref, xkv_ref,
                             wq_ref, bq_ref, wk_ref, bk_ref,
                             wv_ref, bv_ref, wo_ref, bo_ref,
                             w1_ref, b1_ref, w2_ref, b2_ref,
                             g1_ref, be1_ref, g2_ref, be2_ref,
                             o_ref,
                             k_heads, v_heads,
                             *, num_heads):
    H = num_heads
    D = xq_ref.shape[2]
    d_k = D // H
    cdt = k_heads.dtype                       # compute (matmul-operand) dtype
    scale = 1.0 / math.sqrt(d_k)

    def split_heads(t):                       # (rows, D) -> (H, rows, d_k)
        return jnp.stack([t[:, h * d_k:(h + 1) * d_k] for h in range(H)], axis=0)

    def merge_heads(t):                       # (H, rows, d_k) -> (rows, D)
        return jnp.concatenate([t[h] for h in range(H)], axis=-1)

    # --- K/V projections: once per batch element, cached in VMEM scratch ---
    @pl.when(pl.program_id(1) == 0)
    def _():
        xkv = xkv_ref[0]                                              # (S, D)
        k = jnp.dot(xkv, wk_ref[...], preferred_element_type=jnp.float32) + bk_ref[0]
        v = jnp.dot(xkv, wv_ref[...], preferred_element_type=jnp.float32) + bv_ref[0]
        k_heads[...] = split_heads(k).astype(cdt)                     # (H, S, d_k)
        v_heads[...] = split_heads(v).astype(cdt)

    xq = xq_ref[0]                                                    # (Tq, D)

    # --- Q projection; fold 1/sqrt(d_k) into Q (cheaper than scaling scores) ---
    q = jnp.dot(xq, wq_ref[...], preferred_element_type=jnp.float32) + bq_ref[0]
    q3 = split_heads(q * scale).astype(cdt)                           # (H, Tq, d_k)

    # --- batched multi-head attention: one MXU contraction per matmul ---
    scores = jnp.einsum('hqd,hkd->hqk', q3, k_heads[...],
                        preferred_element_type=jnp.float32)           # (H, Tq, S)
    m = jnp.max(scores, axis=-1, keepdims=True)
    e = jnp.exp(scores - m)
    p = e * pl.reciprocal(jnp.sum(e, axis=-1, keepdims=True), approx=True)
    ctx = jnp.einsum('hqk,hkd->hqd', p.astype(cdt), v_heads[...],
                     preferred_element_type=jnp.float32)              # (H, Tq, d_k)
    attn_out = jnp.dot(merge_heads(ctx).astype(cdt), wo_ref[...],
                       preferred_element_type=jnp.float32) + bo_ref[0]

    # --- residual + LayerNorm 1 (f32) ---
    x1 = _layer_norm(xq.astype(jnp.float32) + attn_out, g1_ref[0], be1_ref[0])

    # --- feed forward: exact (erf) GELU, matching nn.GELU() default ---
    h1 = jnp.dot(x1.astype(cdt), w1_ref[...],
                 preferred_element_type=jnp.float32) + b1_ref[0]
    h1 = 0.5 * h1 * (1.0 + lax.erf(h1 * _INV_SQRT2))
    ff = jnp.dot(h1.astype(cdt), w2_ref[...],
                 preferred_element_type=jnp.float32) + b2_ref[0]

    # --- residual + LayerNorm 2 (f32), explicit cast to output dtype ---
    o_ref[0] = _layer_norm(x1 + ff, g2_ref[0], be2_ref[0]).astype(o_ref.dtype)


_PARAM_ORDER = ["wq", "bq", "wk", "bk", "wv", "bv", "wo", "bo",
                "w1", "b1", "w2", "b2", "g1", "be1", "g2", "be2"]


def transformer_block(x, params, num_heads, *, q_tile=None, compute_dtype=None,
                      vmem_limit_bytes=None):
    B, S, D = x.shape
    assert D % num_heads == 0, "d_model must be divisible by num_heads"
    d_k = D // num_heads
    out_dtype = x.dtype
    cdt = jnp.dtype(compute_dtype) if compute_dtype is not None else jnp.dtype(x.dtype)

    if q_tile is None:
        q_tile = S if S <= 128 else 128
    assert S % q_tile == 0, "seq_len must be divisible by q_tile"
    assert q_tile == S or q_tile % 8 == 0, "q_tile must be a multiple of 8"
    n_qt = S // q_tile

    # Cast matmul operands (activations + weights) to the compute dtype up
    # front so HBM->VMEM traffic is also halved on the bf16 path.
    xc = x.astype(cdt)
    pc = {k: v.astype(cdt) for k, v in params.items()}

    def const_spec(shape):                     # grid-invariant parameter block
        n = len(shape)
        return pl.BlockSpec(shape, lambda b, qt, _n=n: (0,) * _n)

    in_specs = [
        pl.BlockSpec((1, q_tile, D), lambda b, qt: (b, qt, 0)),   # query tile
        pl.BlockSpec((1, S, D), lambda b, qt: (b, 0, 0)),         # full seq (K/V source)
    ]
    args = [xc, xc]
    for name in _PARAM_ORDER:
        arr = pc[name]
        in_specs.append(const_spec(arr.shape))
        args.append(arr)

    return pl.pallas_call(
        functools.partial(transformer_block_kernel, num_heads=num_heads),
        out_shape=jax.ShapeDtypeStruct((B, S, D), out_dtype),
        grid_spec=pltpu.PrefetchScalarGridSpec(
            num_scalar_prefetch=0,
            grid=(B, n_qt),
            in_specs=in_specs,
            out_specs=pl.BlockSpec((1, q_tile, D), lambda b, qt: (b, qt, 0)),
            scratch_shapes=[
                pltpu.VMEM((num_heads, S, d_k), cdt),   # cached K (per batch elem)
                pltpu.VMEM((num_heads, S, d_k), cdt),   # cached V (per batch elem)
            ],
        ),
        compiler_params=pltpu.CompilerParams(
            dimension_semantics=("parallel", "arbitrary"),
            vmem_limit_bytes=vmem_limit_bytes),
    )(*args)


# ----------------------- pure-JAX reference (for checking) -----------------------
def reference_block(x, p, num_heads):
    B, S, D = x.shape
    d_k = D // num_heads

    def proj(t, w, b):
        return t @ w + b[0]

    q = proj(x, p["wq"], p["bq"]).reshape(B, S, num_heads, d_k).transpose(0, 2, 1, 3)
    k = proj(x, p["wk"], p["bk"]).reshape(B, S, num_heads, d_k).transpose(0, 2, 1, 3)
    v = proj(x, p["wv"], p["bv"]).reshape(B, S, num_heads, d_k).transpose(0, 2, 1, 3)
    scores = jnp.einsum("bhqd,bhkd->bhqk", q, k) / math.sqrt(d_k)
    attn = jax.nn.softmax(scores, axis=-1)
    out = jnp.einsum("bhqk,bhkd->bhqd", attn, v).transpose(0, 2, 1, 3).reshape(B, S, D)
    out = proj(out, p["wo"], p["bo"])

    def ln(t, g, b):
        m = t.mean(-1, keepdims=True)
        var = ((t - m) ** 2).mean(-1, keepdims=True)
        return (t - m) / jnp.sqrt(var + 1e-5) * g[0] + b[0]

    x1 = ln(x + out, p["g1"], p["be1"])
    h = proj(x1, p["w1"], p["b1"])
    h = 0.5 * h * (1.0 + lax.erf(h * _INV_SQRT2))
    ff = proj(h, p["w2"], p["b2"])
    return ln(x1 + ff, p["g2"], p["be2"])


if __name__ == "__main__":
    B, S, D, H, F = 2, 16, 32, 4, 64          # d_k = 8, grid = (2, 2) with q_tile=8

    key = jax.random.PRNGKey(0)
    keys = jax.random.split(key, 20)
    ki = iter(range(20))

    def nrm(shape, scl=0.02):
        return (scl * jax.random.normal(keys[next(ki)], shape)).astype(jnp.float32)

    params = {
        "wq": nrm((D, D)), "bq": nrm((1, D), 0.01),
        "wk": nrm((D, D)), "bk": nrm((1, D), 0.01),
        "wv": nrm((D, D)), "bv": nrm((1, D), 0.01),
        "wo": nrm((D, D)), "bo": nrm((1, D), 0.01),
        "w1": nrm((D, F)), "b1": nrm((1, F), 0.01),
        "w2": nrm((F, D)), "b2": nrm((1, D), 0.01),
        "g1": 1.0 + nrm((1, D), 0.1), "be1": nrm((1, D), 0.1),
        "g2": 1.0 + nrm((1, D), 0.1), "be2": nrm((1, D), 0.1),
    }

    x = jax.random.normal(keys[next(ki)], (B, S, D), dtype=jnp.float32)

    ref = reference_block(x, params, num_heads=H)

    # f32 compute path (default), q-tiled grid
    out = transformer_block(x, params, num_heads=H, q_tile=8)
    out = jax.block_until_ready(out)
    assert out.shape == (B, S, D)
    assert jnp.allclose(out, ref, atol=5e-3, rtol=5e-3), "f32 kernel mismatch vs reference"

    # bf16 matmul-operand path with f32 accumulation
    out_bf16 = transformer_block(x, params, num_heads=H, q_tile=8,
                                 compute_dtype=jnp.bfloat16)
    out_bf16 = jax.block_until_ready(out_bf16)
    assert out_bf16.shape == (B, S, D) and out_bf16.dtype == x.dtype
    assert jnp.allclose(out_bf16, ref, atol=1e-1, rtol=1e-1), "bf16 kernel mismatch vs reference"

    print("KERNEL_OK")
</pallas_src>

<mosaic_0001>
module attributes {stable_mosaic.version = 11 : i64} {
  func.func @transformer_block_kernel(%arg0: i32, %arg1: i32, %arg2: memref<1x8x32xf32, #tpu.memory_space<vmem>>, %arg3: memref<1x16x32xf32, #tpu.memory_space<vmem>>, %arg4: memref<32x32xf32, #tpu.memory_space<vmem>>, %arg5: memref<1x32xf32, #tpu.memory_space<vmem>>, %arg6: memref<32x32xf32, #tpu.memory_space<vmem>>, %arg7: memref<1x32xf32, #tpu.memory_space<vmem>>, %arg8: memref<32x32xf32, #tpu.memory_space<vmem>>, %arg9: memref<1x32xf32, #tpu.memory_space<vmem>>, %arg10: memref<32x32xf32, #tpu.memory_space<vmem>>, %arg11: memref<1x32xf32, #tpu.memory_space<vmem>>, %arg12: memref<32x64xf32, #tpu.memory_space<vmem>>, %arg13: memref<1x64xf32, #tpu.memory_space<vmem>>, %arg14: memref<64x32xf32, #tpu.memory_space<vmem>>, %arg15: memref<1x32xf32, #tpu.memory_space<vmem>>, %arg16: memref<1x32xf32, #tpu.memory_space<vmem>>, %arg17: memref<1x32xf32, #tpu.memory_space<vmem>>, %arg18: memref<1x32xf32, #tpu.memory_space<vmem>>, %arg19: memref<1x32xf32, #tpu.memory_space<vmem>>, %arg20: memref<1x8x32xf32, #tpu.memory_space<vmem>>, %arg21: memref<4x16x8xf32, #tpu.memory_space<vmem>>, %arg22: memref<4x16x8xf32, #tpu.memory_space<vmem>>) attributes {dimension_semantics = [#tpu.dimension_semantics<parallel>, #tpu.dimension_semantics<arbitrary>], iteration_bounds = array<i64: 2, 2>, scalar_prefetch = 0 : i64, scratch_operands = 2 : i64, tpu.core_type = #tpu.core_type<tc>, window_params = [{transform_indices = @transform_0, window_bounds = array<i64: 1, 8, 32>}, {transform_indices = @transform_1, window_bounds = array<i64: 1, 16, 32>}, {pipeline_mode = #tpu.pipeline_mode<synchronous>, transform_indices = @transform_2, window_bounds = array<i64: 32, 32>}, {pipeline_mode = #tpu.pipeline_mode<synchronous>, transform_indices = @transform_3, window_bounds = array<i64: 1, 32>}, {pipeline_mode = #tpu.pipeline_mode<synchronous>, transform_indices = @transform_4, window_bounds = array<i64: 32, 32>}, {pipeline_mode = #tpu.pipeline_mode<synchronous>, transform_indices = @transform_5, window_bounds = array<i64: 1, 32>}, {pipeline_mode = #tpu.pipeline_mode<synchronous>, transform_indices = @transform_6, window_bounds = array<i64: 32, 32>}, {pipeline_mode = #tpu.pipeline_mode<synchronous>, transform_indices = @transform_7, window_bounds = array<i64: 1, 32>}, {pipeline_mode = #tpu.pipeline_mode<synchronous>, transform_indices = @transform_8, window_bounds = array<i64: 32, 32>}, {pipeline_mode = #tpu.pipeline_mode<synchronous>, transform_indices = @transform_9, window_bounds = array<i64: 1, 32>}, {pipeline_mode = #tpu.pipeline_mode<synchronous>, transform_indices = @transform_10, window_bounds = array<i64: 32, 64>}, {pipeline_mode = #tpu.pipeline_mode<synchronous>, transform_indices = @transform_11, window_bounds = array<i64: 1, 64>}, {pipeline_mode = #tpu.pipeline_mode<synchronous>, transform_indices = @transform_12, window_bounds = array<i64: 64, 32>}, {pipeline_mode = #tpu.pipeline_mode<synchronous>, transform_indices = @transform_13, window_bounds = array<i64: 1, 32>}, {pipeline_mode = #tpu.pipeline_mode<synchronous>, transform_indices = @transform_14, window_bounds = array<i64: 1, 32>}, {pipeline_mode = #tpu.pipeline_mode<synchronous>, transform_indices = @transform_15, window_bounds = array<i64: 1, 32>}, {pipeline_mode = #tpu.pipeline_mode<synchronous>, transform_indices = @transform_16, window_bounds = array<i64: 1, 32>}, {pipeline_mode = #tpu.pipeline_mode<synchronous>, transform_indices = @transform_17, window_bounds = array<i64: 1, 32>}, {transform_indices = @transform_18, window_bounds = array<i64: 1, 8, 32>}]} {
    %c0_i32 = arith.constant 0 : i32
    %0 = arith.cmpi eq, %arg1, %c0_i32 : i32
    %1 = arith.extui %0 : i1 to i32
    %c0_i32_0 = arith.constant 0 : i32
    %2 = arith.cmpi ne, %1, %c0_i32_0 : i32
    scf.if %2 {
      %c0_57 = arith.constant 0 : index
      %c0_58 = arith.constant 0 : index
      %c0_59 = arith.constant 0 : index
      %136 = vector.load %arg3[%c0_57, %c0_58, %c0_59] : memref<1x16x32xf32, #tpu.memory_space<vmem>>, vector<1x16x32xf32>
      %137 = vector.shape_cast %136 : vector<1x16x32xf32> to vector<16x32xf32>
      %c0_60 = arith.constant 0 : index
      %c0_61 = arith.constant 0 : index
      %138 = vector.load %arg6[%c0_60, %c0_61] : memref<32x32xf32, #tpu.memory_space<vmem>>, vector<32x32xf32>
      %cst_62 = arith.constant dense<0.000000e+00> : vector<16x32xf32>
      %139 = tpu.matmul %137, %138, %cst_62 {dimension_numbers = #tpu.dot_dimension_numbers<[1], [0], [0], [1], [0, 0, 1, 1], [], []>} : vector<16x32xf32>, vector<32x32xf32>, vector<16x32xf32> -> vector<16x32xf32>
      %c0_63 = arith.constant 0 : index
      %c0_64 = arith.constant 0 : index
      %140 = vector.load %arg7[%c0_63, %c0_64] : memref<1x32xf32, #tpu.memory_space<vmem>>, vector<1x32xf32>
      %141 = vector.shape_cast %140 : vector<1x32xf32> to vector<32xf32>
      %142 = vector.shape_cast %141 : vector<32xf32> to vector<1x32xf32>
      %143 = vector.broadcast %142 : vector<1x32xf32> to vector<16x32xf32>
      %144 = arith.addf %139, %143 : vector<16x32xf32>
      %c0_65 = arith.constant 0 : index
      %c0_66 = arith.constant 0 : index
      %145 = vector.load %arg8[%c0_65, %c0_66] : memref<32x32xf32, #tpu.memory_space<vmem>>, vector<32x32xf32>
      %cst_67 = arith.constant dense<0.000000e+00> : vector<16x32xf32>
      %146 = tpu.matmul %137, %145, %cst_67 {dimension_numbers = #tpu.dot_dimension_numbers<[1], [0], [0], [1], [0, 0, 1, 1], [], []>} : vector<16x32xf32>, vector<32x32xf32>, vector<16x32xf32> -> vector<16x32xf32>
      %c0_68 = arith.constant 0 : index
      %c0_69 = arith.constant 0 : index
      %147 = vector.load %arg9[%c0_68, %c0_69] : memref<1x32xf32, #tpu.memory_space<vmem>>, vector<1x32xf32>
      %148 = vector.shape_cast %147 : vector<1x32xf32> to vector<32xf32>
      %149 = vector.shape_cast %148 : vector<32xf32> to vector<1x32xf32>
      %150 = vector.broadcast %149 : vector<1x32xf32> to vector<16x32xf32>
      %151 = arith.addf %146, %150 : vector<16x32xf32>
      %152 = vector.extract_strided_slice %144 {offsets = [0, 0], sizes = [16, 8], strides = [1, 1]} : vector<16x32xf32> to vector<16x8xf32>
      %153 = vector.extract_strided_slice %144 {offsets = [0, 8], sizes = [16, 8], strides = [1, 1]} : vector<16x32xf32> to vector<16x8xf32>
      %154 = vector.extract_strided_slice %144 {offsets = [0, 16], sizes = [16, 8], strides = [1, 1]} : vector<16x32xf32> to vector<16x8xf32>
      %155 = vector.extract_strided_slice %144 {offsets = [0, 24], sizes = [16, 8], strides = [1, 1]} : vector<16x32xf32> to vector<16x8xf32>
      %156 = vector.shape_cast %152 : vector<16x8xf32> to vector<1x16x8xf32>
      %157 = vector.shape_cast %153 : vector<16x8xf32> to vector<1x16x8xf32>
      %158 = vector.shape_cast %154 : vector<16x8xf32> to vector<1x16x8xf32>
      %159 = vector.shape_cast %155 : vector<16x8xf32> to vector<1x16x8xf32>
      %160 = tpu.concatenate %156, %157, %158, %159 in 0 : vector<1x16x8xf32>, vector<1x16x8xf32>, vector<1x16x8xf32>, vector<1x16x8xf32> -> vector<4x16x8xf32>
      %c0_70 = arith.constant 0 : index
      %c0_71 = arith.constant 0 : index
      %c0_72 = arith.constant 0 : index
      %161 = vector.load %arg21[%c0_70, %c0_71, %c0_72] : memref<4x16x8xf32, #tpu.memory_space<vmem>>, vector<4x16x8xf32>
      tpu.vector_store %arg21[%c0_70, %c0_71, %c0_72], %160 {strides = array<i32>} : memref<4x16x8xf32, #tpu.memory_space<vmem>>, vector<4x16x8xf32>,
      %162 = vector.extract_strided_slice %151 {offsets = [0, 0], sizes = [16, 8], strides = [1, 1]} : vector<16x32xf32> to vector<16x8xf32>
      %163 = vector.extract_strided_slice %151 {offsets = [0, 8], sizes = [16, 8], strides = [1, 1]} : vector<16x32xf32> to vector<16x8xf32>
      %164 = vector.extract_strided_slice %151 {offsets = [0, 16], sizes = [16, 8], strides = [1, 1]} : vector<16x32xf32> to vector<16x8xf32>
      %165 = vector.extract_strided_slice %151 {offsets = [0, 24], sizes = [16, 8], strides = [1, 1]} : vector<16x32xf32> to vector<16x8xf32>
      %166 = vector.shape_cast %162 : vector<16x8xf32> to vector<1x16x8xf32>
      %167 = vector.shape_cast %163 : vector<16x8xf32> to vector<1x16x8xf32>
      %168 = vector.shape_cast %164 : vector<16x8xf32> to vector<1x16x8xf32>
      %169 = vector.shape_cast %165 : vector<16x8xf32> to vector<1x16x8xf32>
      %170 = tpu.concatenate %166, %167, %168, %169 in 0 : vector<1x16x8xf32>, vector<1x16x8xf32>, vector<1x16x8xf32>, vector<1x16x8xf32> -> vector<4x16x8xf32>
      %c0_73 = arith.constant 0 : index
      %c0_74 = arith.constant 0 : index
      %c0_75 = arith.constant 0 : index
      %171 = vector.load %arg22[%c0_73, %c0_74, %c0_75] : memref<4x16x8xf32, #tpu.memory_space<vmem>>, vector<4x16x8xf32>
      tpu.vector_store %arg22[%c0_73, %c0_74, %c0_75], %170 {strides = array<i32>} : memref<4x16x8xf32, #tpu.memory_space<vmem>>, vector<4x16x8xf32>,
    } else {
    }
    %c0 = arith.constant 0 : index
    %c0_1 = arith.constant 0 : index
    %c0_2 = arith.constant 0 : index
    %3 = vector.load %arg2[%c0, %c0_1, %c0_2] : memref<1x8x32xf32, #tpu.memory_space<vmem>>, vector<1x8x32xf32>
    %4 = vector.shape_cast %3 : vector<1x8x32xf32> to vector<8x32xf32>
    %c0_3 = arith.constant 0 : index
    %c0_4 = arith.constant 0 : index
    %5 = vector.load %arg4[%c0_3, %c0_4] : memref<32x32xf32, #tpu.memory_space<vmem>>, vector<32x32xf32>
    %cst = arith.constant dense<0.000000e+00> : vector<8x32xf32>
    %6 = tpu.matmul %4, %5, %cst {dimension_numbers = #tpu.dot_dimension_numbers<[1], [0], [0], [1], [0, 0, 1, 1], [], []>} : vector<8x32xf32>, vector<32x32xf32>, vector<8x32xf32> -> vector<8x32xf32>
    %c0_5 = arith.constant 0 : index
    %c0_6 = arith.constant 0 : index
    %7 = vector.load %arg5[%c0_5, %c0_6] : memref<1x32xf32, #tpu.memory_space<vmem>>, vector<1x32xf32>
    %8 = vector.shape_cast %7 : vector<1x32xf32> to vector<32xf32>
    %9 = vector.shape_cast %8 : vector<32xf32> to vector<1x32xf32>
    %10 = vector.broadcast %9 : vector<1x32xf32> to vector<8x32xf32>
    %11 = arith.addf %6, %10 : vector<8x32xf32>
    %cst_7 = arith.constant 0.353553385 : f32
    %12 = vector.broadcast %cst_7 : f32 to vector<8x32xf32>
    %13 = arith.mulf %11, %12 : vector<8x32xf32>
    %14 = vector.extract_strided_slice %13 {offsets = [0, 0], sizes = [8, 8], strides = [1, 1]} : vector<8x32xf32> to vector<8x8xf32>
    %15 = vector.extract_strided_slice %13 {offsets = [0, 8], sizes = [8, 8], strides = [1, 1]} : vector<8x32xf32> to vector<8x8xf32>
    %16 = vector.extract_strided_slice %13 {offsets = [0, 16], sizes = [8, 8], strides = [1, 1]} : vector<8x32xf32> to vector<8x8xf32>
    %17 = vector.extract_strided_slice %13 {offsets = [0, 24], sizes = [8, 8], strides = [1, 1]} : vector<8x32xf32> to vector<8x8xf32>
    %18 = vector.shape_cast %14 : vector<8x8xf32> to vector<1x8x8xf32>
    %19 = vector.shape_cast %15 : vector<8x8xf32> to vector<1x8x8xf32>
    %20 = vector.shape_cast %16 : vector<8x8xf32> to vector<1x8x8xf32>
    %21 = vector.shape_cast %17 : vector<8x8xf32> to vector<1x8x8xf32>
    %22 = tpu.concatenate %18, %19, %20, %21 in 0 : vector<1x8x8xf32>, vector<1x8x8xf32>, vector<1x8x8xf32>, vector<1x8x8xf32> -> vector<4x8x8xf32>
    %c0_8 = arith.constant 0 : index
    %c0_9 = arith.constant 0 : index
    %c0_10 = arith.constant 0 : index
    %23 = vector.load %arg21[%c0_8, %c0_9, %c0_10] : memref<4x16x8xf32, #tpu.memory_space<vmem>>, vector<4x16x8xf32>
    "tpu.trace_start"() <{level = 10 : i32, message = "hqd,hkd->hqk"}> : () -> ()
    %cst_11 = arith.constant dense<0.000000e+00> : vector<4x8x16xf32>
    %24 = tpu.matmul %22, %23, %cst_11 {dimension_numbers = #tpu.dot_dimension_numbers<[2], [2], [1], [1], [0, 0, 0, 1, 1, 1], [0], [0]>} : vector<4x8x8xf32>, vector<4x16x8xf32>, vector<4x8x16xf32> -> vector<4x8x16xf32>
    "tpu.trace_stop"() : () -> ()
    %cst_12 = arith.constant dense<0xFF800000> : vector<4x8xf32>
    %25 = vector.multi_reduction <maximumf>, %24, %cst_12 [2] : vector<4x8x16xf32> to vector<4x8xf32>
    %26 = vector.shape_cast %25 : vector<4x8xf32> to vector<4x8x1xf32>
    %27 = vector.broadcast %26 : vector<4x8x1xf32> to vector<4x8x16xf32>
    %28 = arith.subf %24, %27 : vector<4x8x16xf32>
    %29 = math.exp %28 : vector<4x8x16xf32>
    %cst_13 = arith.constant dense<0.000000e+00> : vector<4x8xf32>
    %30 = vector.multi_reduction <add>, %29, %cst_13 [2] : vector<4x8x16xf32> to vector<4x8xf32>
    %31 = vector.shape_cast %30 : vector<4x8xf32> to vector<4x8x1xf32>
    %32 = tpu.reciprocal %31 {approx = true} : vector<4x8x1xf32> -> vector<4x8x1xf32>
    %33 = vector.broadcast %32 : vector<4x8x1xf32> to vector<4x8x16xf32>
    %34 = arith.mulf %29, %33 : vector<4x8x16xf32>
    %c0_14 = arith.constant 0 : index
    %c0_15 = arith.constant 0 : index
    %c0_16 = arith.constant 0 : index
    %35 = vector.load %arg22[%c0_14, %c0_15, %c0_16] : memref<4x16x8xf32, #tpu.memory_space<vmem>>, vector<4x16x8xf32>
    "tpu.trace_start"() <{level = 10 : i32, message = "hqk,hkd->hqd"}> : () -> ()
    %cst_17 = arith.constant dense<0.000000e+00> : vector<4x8x8xf32>
    %36 = tpu.matmul %34, %35, %cst_17 {dimension_numbers = #tpu.dot_dimension_numbers<[2], [1], [1], [2], [0, 0, 0, 1, 1, 2], [0], [0]>} : vector<4x8x16xf32>, vector<4x16x8xf32>, vector<4x8x8xf32> -> vector<4x8x8xf32>
    "tpu.trace_stop"() : () -> ()
    %37 = vector.extract_strided_slice %36 {offsets = [0, 0, 0], sizes = [1, 8, 8], strides = [1, 1, 1]} : vector<4x8x8xf32> to vector<1x8x8xf32>
    %38 = vector.shape_cast %37 : vector<1x8x8xf32> to vector<8x8xf32>
    %39 = vector.extract_strided_slice %36 {offsets = [1, 0, 0], sizes = [1, 8, 8], strides = [1, 1, 1]} : vector<4x8x8xf32> to vector<1x8x8xf32>
    %40 = vector.shape_cast %39 : vector<1x8x8xf32> to vector<8x8xf32>
    %41 = vector.extract_strided_slice %36 {offsets = [2, 0, 0], sizes = [1, 8, 8], strides = [1, 1, 1]} : vector<4x8x8xf32> to vector<1x8x8xf32>
    %42 = vector.shape_cast %41 : vector<1x8x8xf32> to vector<8x8xf32>
    %43 = vector.extract_strided_slice %36 {offsets = [3, 0, 0], sizes = [1, 8, 8], strides = [1, 1, 1]} : vector<4x8x8xf32> to vector<1x8x8xf32>
    %44 = vector.shape_cast %43 : vector<1x8x8xf32> to vector<8x8xf32>
    %45 = tpu.concatenate %38, %40, %42, %44 in 1 : vector<8x8xf32>, vector<8x8xf32>, vector<8x8xf32>, vector<8x8xf32> -> vector<8x32xf32>
    %c0_18 = arith.constant 0 : index
    %c0_19 = arith.constant 0 : index
    %46 = vector.load %arg10[%c0_18, %c0_19] : memref<32x32xf32, #tpu.memory_space<vmem>>, vector<32x32xf32>
    %cst_20 = arith.constant dense<0.000000e+00> : vector<8x32xf32>
    %47 = tpu.matmul %45, %46, %cst_20 {dimension_numbers = #tpu.dot_dimension_numbers<[1], [0], [0], [1], [0, 0, 1, 1], [], []>} : vector<8x32xf32>, vector<32x32xf32>, vector<8x32xf32> -> vector<8x32xf32>
    %c0_21 = arith.constant 0 : index
    %c0_22 = arith.constant 0 : index
    %48 = vector.load %arg11[%c0_21, %c0_22] : memref<1x32xf32, #tpu.memory_space<vmem>>, vector<1x32xf32>
    %49 = vector.shape_cast %48 : vector<1x32xf32> to vector<32xf32>
    %50 = vector.shape_cast %49 : vector<32xf32> to vector<1x32xf32>
    %51 = vector.broadcast %50 : vector<1x32xf32> to vector<8x32xf32>
    %52 = arith.addf %47, %51 : vector<8x32xf32>
    %53 = arith.addf %4, %52 : vector<8x32xf32>
    %c0_23 = arith.constant 0 : index
    %c0_24 = arith.constant 0 : index
    %54 = vector.load %arg16[%c0_23, %c0_24] : memref<1x32xf32, #tpu.memory_space<vmem>>, vector<1x32xf32>
    %55 = vector.shape_cast %54 : vector<1x32xf32> to vector<32xf32>
    %c0_25 = arith.constant 0 : index
    %c0_26 = arith.constant 0 : index
    %56 = vector.load %arg17[%c0_25, %c0_26] : memref<1x32xf32, #tpu.memory_space<vmem>>, vector<1x32xf32>
    %57 = vector.shape_cast %56 : vector<1x32xf32> to vector<32xf32>
    %cst_27 = arith.constant dense<0.000000e+00> : vector<8xf32>
    %58 = vector.multi_reduction <add>, %53, %cst_27 [1] : vector<8x32xf32> to vector<8xf32>
    %59 = vector.shape_cast %58 : vector<8xf32> to vector<8x1xf32>
    %cst_28 = arith.constant 3.200000e+01 : f32
    %60 = vector.broadcast %cst_28 : f32 to vector<8x1xf32>
    %61 = arith.divf %59, %60 : vector<8x1xf32>
    %62 = vector.broadcast %61 : vector<8x1xf32> to vector<8x32xf32>
    %63 = arith.subf %53, %62 : vector<8x32xf32>
    %64 = arith.mulf %63, %63 : vector<8x32xf32>
    %cst_29 = arith.constant dense<0.000000e+00> : vector<8xf32>
    %65 = vector.multi_reduction <add>, %64, %cst_29 [1] : vector<8x32xf32> to vector<8xf32>
    %66 = vector.shape_cast %65 : vector<8xf32> to vector<8x1xf32>
    %cst_30 = arith.constant 3.200000e+01 : f32
    %67 = vector.broadcast %cst_30 : f32 to vector<8x1xf32>
    %68 = arith.divf %66, %67 : vector<8x1xf32>
    %69 = vector.broadcast %61 : vector<8x1xf32> to vector<8x32xf32>
    %70 = arith.subf %53, %69 : vector<8x32xf32>
    %cst_31 = arith.constant 9.99999974E-6 : f32
    %71 = vector.broadcast %cst_31 : f32 to vector<8x1xf32>
    %72 = arith.addf %68, %71 : vector<8x1xf32>
    %73 = math.rsqrt %72 : vector<8x1xf32>
    %74 = vector.broadcast %73 : vector<8x1xf32> to vector<8x32xf32>
    %75 = arith.mulf %70, %74 : vector<8x32xf32>
    %76 = vector.shape_cast %55 : vector<32xf32> to vector<1x32xf32>
    %77 = vector.broadcast %76 : vector<1x32xf32> to vector<8x32xf32>
    %78 = arith.mulf %75, %77 : vector<8x32xf32>
    %79 = vector.shape_cast %57 : vector<32xf32> to vector<1x32xf32>
    %80 = vector.broadcast %79 : vector<1x32xf32> to vector<8x32xf32>
    %81 = arith.addf %78, %80 : vector<8x32xf32>
    %c0_32 = arith.constant 0 : index
    %c0_33 = arith.constant 0 : index
    %82 = vector.load %arg12[%c0_32, %c0_33] : memref<32x64xf32, #tpu.memory_space<vmem>>, vector<32x64xf32>
    %cst_34 = arith.constant dense<0.000000e+00> : vector<8x64xf32>
    %83 = tpu.matmul %81, %82, %cst_34 {dimension_numbers = #tpu.dot_dimension_numbers<[1], [0], [0], [1], [0, 0, 1, 1], [], []>} : vector<8x32xf32>, vector<32x64xf32>, vector<8x64xf32> -> vector<8x64xf32>
    %c0_35 = arith.constant 0 : index
    %c0_36 = arith.constant 0 : index
    %84 = vector.load %arg13[%c0_35, %c0_36] : memref<1x64xf32, #tpu.memory_space<vmem>>, vector<1x64xf32>
    %85 = vector.shape_cast %84 : vector<1x64xf32> to vector<64xf32>
    %86 = vector.shape_cast %85 : vector<64xf32> to vector<1x64xf32>
    %87 = vector.broadcast %86 : vector<1x64xf32> to vector<8x64xf32>
    %88 = arith.addf %83, %87 : vector<8x64xf32>
    %cst_37 = arith.constant 5.000000e-01 : f32
    %89 = vector.broadcast %cst_37 : f32 to vector<8x64xf32>
    %90 = arith.mulf %89, %88 : vector<8x64xf32>
    %cst_38 = arith.constant 0.707106769 : f32
    %91 = vector.broadcast %cst_38 : f32 to vector<8x64xf32>
    %92 = arith.mulf %88, %91 : vector<8x64xf32>
    %93 = math.erf %92 : vector<8x64xf32>
    %cst_39 = arith.constant 1.000000e+00 : f32
    %94 = vector.broadcast %cst_39 : f32 to vector<8x64xf32>
    %95 = arith.addf %94, %93 : vector<8x64xf32>
    %96 = arith.mulf %90, %95 : vector<8x64xf32>
    %c0_40 = arith.constant 0 : index
    %c0_41 = arith.constant 0 : index
    %97 = vector.load %arg14[%c0_40, %c0_41] : memref<64x32xf32, #tpu.memory_space<vmem>>, vector<64x32xf32>
    %cst_42 = arith.constant dense<0.000000e+00> : vector<8x32xf32>
    %98 = tpu.matmul %96, %97, %cst_42 {dimension_numbers = #tpu.dot_dimension_numbers<[1], [0], [0], [1], [0, 0, 1, 1], [], []>} : vector<8x64xf32>, vector<64x32xf32>, vector<8x32xf32> -> vector<8x32xf32>
    %c0_43 = arith.constant 0 : index
    %c0_44 = arith.constant 0 : index
    %99 = vector.load %arg15[%c0_43, %c0_44] : memref<1x32xf32, #tpu.memory_space<vmem>>, vector<1x32xf32>
    %100 = vector.shape_cast %99 : vector<1x32xf32> to vector<32xf32>
    %101 = vector.shape_cast %100 : vector<32xf32> to vector<1x32xf32>
    %102 = vector.broadcast %101 : vector<1x32xf32> to vector<8x32xf32>
    %103 = arith.addf %98, %102 : vector<8x32xf32>
    %104 = arith.addf %81, %103 : vector<8x32xf32>
    %c0_45 = arith.constant 0 : index
    %c0_46 = arith.constant 0 : index
    %105 = vector.load %arg18[%c0_45, %c0_46] : memref<1x32xf32, #tpu.memory_space<vmem>>, vector<1x32xf32>
    %106 = vector.shape_cast %105 : vector<1x32xf32> to vector<32xf32>
    %c0_47 = arith.constant 0 : index
    %c0_48 = arith.constant 0 : index
    %107 = vector.load %arg19[%c0_47, %c0_48] : memref<1x32xf32, #tpu.memory_space<vmem>>, vector<1x32xf32>
    %108 = vector.shape_cast %107 : vector<1x32xf32> to vector<32xf32>
    %cst_49 = arith.constant dense<0.000000e+00> : vector<8xf32>
    %109 = vector.multi_reduction <add>, %104, %cst_49 [1] : vector<8x32xf32> to vector<8xf32>
    %110 = vector.shape_cast %109 : vector<8xf32> to vector<8x1xf32>
    %cst_50 = arith.constant 3.200000e+01 : f32
    %111 = vector.broadcast %cst_50 : f32 to vector<8x1xf32>
    %112 = arith.divf %110, %111 : vector<8x1xf32>
    %113 = vector.broadcast %112 : vector<8x1xf32> to vector<8x32xf32>
    %114 = arith.subf %104, %113 : vector<8x32xf32>
    %115 = arith.mulf %114, %114 : vector<8x32xf32>
    %cst_51 = arith.constant dense<0.000000e+00> : vector<8xf32>
    %116 = vector.multi_reduction <add>, %115, %cst_51 [1] : vector<8x32xf32> to vector<8xf32>
    %117 = vector.shape_cast %116 : vector<8xf32> to vector<8x1xf32>
    %cst_52 = arith.constant 3.200000e+01 : f32
    %118 = vector.broadcast %cst_52 : f32 to vector<8x1xf32>
    %119 = arith.divf %117, %118 : vector<8x1xf32>
    %120 = vector.broadcast %112 : vector<8x1xf32> to vector<8x32xf32>
    %121 = arith.subf %104, %120 : vector<8x32xf32>
    %cst_53 = arith.constant 9.99999974E-6 : f32
    %122 = vector.broadcast %cst_53 : f32 to vector<8x1xf32>
    %123 = arith.addf %119, %122 : vector<8x1xf32>
    %124 = math.rsqrt %123 : vector<8x1xf32>
    %125 = vector.broadcast %124 : vector<8x1xf32> to vector<8x32xf32>
    %126 = arith.mulf %121, %125 : vector<8x32xf32>
    %127 = vector.shape_cast %106 : vector<32xf32> to vector<1x32xf32>
    %128 = vector.broadcast %127 : vector<1x32xf32> to vector<8x32xf32>
    %129 = arith.mulf %126, %128 : vector<8x32xf32>
    %130 = vector.shape_cast %108 : vector<32xf32> to vector<1x32xf32>
    %131 = vector.broadcast %130 : vector<1x32xf32> to vector<8x32xf32>
    %132 = arith.addf %129, %131 : vector<8x32xf32>
    %c0_54 = arith.constant 0 : index
    %c0_55 = arith.constant 0 : index
    %c0_56 = arith.constant 0 : index
    %133 = vector.load %arg20[%c0_54, %c0_55, %c0_56] : memref<1x8x32xf32, #tpu.memory_space<vmem>>, vector<1x8x32xf32>
    %134 = vector.shape_cast %133 : vector<1x8x32xf32> to vector<8x32xf32>
    %135 = vector.shape_cast %132 : vector<8x32xf32> to vector<1x8x32xf32>
    tpu.vector_store %arg20[%c0_54, %c0_55, %c0_56], %135 {strides = array<i32>} : memref<1x8x32xf32, #tpu.memory_space<vmem>>, vector<1x8x32xf32>,
    return
  }
  func.func @transform_0(%arg0: i32, %arg1: i32) -> (i32, i32, i32) {
    %c0_i32 = arith.constant 0 : i32
    %c0_i32_0 = arith.constant 0 : i32
    return %arg0, %arg1, %c0_i32 : i32, i32, i32
  }
  func.func @transform_1(%arg0: i32, %arg1: i32) -> (i32, i32, i32) {
    %c0_i32 = arith.constant 0 : i32
    %c0_i32_0 = arith.constant 0 : i32
    %c0_i32_1 = arith.constant 0 : i32
    return %arg0, %c0_i32, %c0_i32_0 : i32, i32, i32
  }
  func.func @transform_2(%arg0: i32, %arg1: i32) -> (i32, i32) {
    %c0_i32 = arith.constant 0 : i32
    %c0_i32_0 = arith.constant 0 : i32
    %c0_i32_1 = arith.constant 0 : i32
    return %c0_i32, %c0_i32_0 : i32, i32
  }
  func.func @transform_3(%arg0: i32, %arg1: i32) -> (i32, i32) {
    %c0_i32 = arith.constant 0 : i32
    %c0_i32_0 = arith.constant 0 : i32
    %c0_i32_1 = arith.constant 0 : i32
    return %c0_i32, %c0_i32_0 : i32, i32
  }
  func.func @transform_4(%arg0: i32, %arg1: i32) -> (i32, i32) {
    %c0_i32 = arith.constant 0 : i32
    %c0_i32_0 = arith.constant 0 : i32
    %c0_i32_1 = arith.constant 0 : i32
    return %c0_i32, %c0_i32_0 : i32, i32
  }
  func.func @transform_5(%arg0: i32, %arg1: i32) -> (i32, i32) {
    %c0_i32 = arith.constant 0 : i32
    %c0_i32_0 = arith.constant 0 : i32
    %c0_i32_1 = arith.constant 0 : i32
    return %c0_i32, %c0_i32_0 : i32, i32
  }
  func.func @transform_6(%arg0: i32, %arg1: i32) -> (i32, i32) {
    %c0_i32 = arith.constant 0 : i32
    %c0_i32_0 = arith.constant 0 : i32
    %c0_i32_1 = arith.constant 0 : i32
    return %c0_i32, %c0_i32_0 : i32, i32
  }
  func.func @transform_7(%arg0: i32, %arg1: i32) -> (i32, i32) {
    %c0_i32 = arith.constant 0 : i32
    %c0_i32_0 = arith.constant 0 : i32
    %c0_i32_1 = arith.constant 0 : i32
    return %c0_i32, %c0_i32_0 : i32, i32
  }
  func.func @transform_8(%arg0: i32, %arg1: i32) -> (i32, i32) {
    %c0_i32 = arith.constant 0 : i32
    %c0_i32_0 = arith.constant 0 : i32
    %c0_i32_1 = arith.constant 0 : i32
    return %c0_i32, %c0_i32_0 : i32, i32
  }
  func.func @transform_9(%arg0: i32, %arg1: i32) -> (i32, i32) {
    %c0_i32 = arith.constant 0 : i32
    %c0_i32_0 = arith.constant 0 : i32
    %c0_i32_1 = arith.constant 0 : i32
    return %c0_i32, %c0_i32_0 : i32, i32
  }
  func.func @transform_10(%arg0: i32, %arg1: i32) -> (i32, i32) {
    %c0_i32 = arith.constant 0 : i32
    %c0_i32_0 = arith.constant 0 : i32
    %c0_i32_1 = arith.constant 0 : i32
    return %c0_i32, %c0_i32_0 : i32, i32
  }
  func.func @transform_11(%arg0: i32, %arg1: i32) -> (i32, i32) {
    %c0_i32 = arith.constant 0 : i32
    %c0_i32_0 = arith.constant 0 : i32
    %c0_i32_1 = arith.constant 0 : i32
    return %c0_i32, %c0_i32_0 : i32, i32
  }
  func.func @transform_12(%arg0: i32, %arg1: i32) -> (i32, i32) {
    %c0_i32 = arith.constant 0 : i32
    %c0_i32_0 = arith.constant 0 : i32
    %c0_i32_1 = arith.constant 0 : i32
    return %c0_i32, %c0_i32_0 : i32, i32
  }
  func.func @transform_13(%arg0: i32, %arg1: i32) -> (i32, i32) {
    %c0_i32 = arith.constant 0 : i32
    %c0_i32_0 = arith.constant 0 : i32
    %c0_i32_1 = arith.constant 0 : i32
    return %c0_i32, %c0_i32_0 : i32, i32
  }
  func.func @transform_14(%arg0: i32, %arg1: i32) -> (i32, i32) {
    %c0_i32 = arith.constant 0 : i32
    %c0_i32_0 = arith.constant 0 : i32
    %c0_i32_1 = arith.constant 0 : i32
    return %c0_i32, %c0_i32_0 : i32, i32
  }
  func.func @transform_15(%arg0: i32, %arg1: i32) -> (i32, i32) {
    %c0_i32 = arith.constant 0 : i32
    %c0_i32_0 = arith.constant 0 : i32
    %c0_i32_1 = arith.constant 0 : i32
    return %c0_i32, %c0_i32_0 : i32, i32
  }
  func.func @transform_16(%arg0: i32, %arg1: i32) -> (i32, i32) {
    %c0_i32 = arith.constant 0 : i32
    %c0_i32_0 = arith.constant 0 : i32
    %c0_i32_1 = arith.constant 0 : i32
    return %c0_i32, %c0_i32_0 : i32, i32
  }
  func.func @transform_17(%arg0: i32, %arg1: i32) -> (i32, i32) {
    %c0_i32 = arith.constant 0 : i32
    %c0_i32_0 = arith.constant 0 : i32
    %c0_i32_1 = arith.constant 0 : i32
    return %c0_i32, %c0_i32_0 : i32, i32
  }
  func.func @transform_18(%arg0: i32, %arg1: i32) -> (i32, i32, i32) {
    %c0_i32 = arith.constant 0 : i32
    %c0_i32_0 = arith.constant 0 : i32
    return %arg0, %arg1, %c0_i32 : i32, i32, i32
  }
}

</mosaic_0001>

<bundles_post_ra>
// kernel: tpu_custom_call.1
= control target key start
LH: loop header
LB: loop body
LE: loop exit
PB: predicated region body
PF: predicated region fallthrough
CT: control target
= control target key end

     0   :  { %s3426_s0 = inlined_call_operand.vmem [shape: f32[2,16,32], index: 0, kind: input, shape index: {}]   ;;  %s3427_s1 = inlined_call_operand.vmem [shape: f32[2,16,32], index: 1, kind: input, shape index: {}]   ;;  %s3428_s2 = inlined_call_operand.vmem [shape: f32[32,32], index: 2, kind: input, shape index: {}]   ;;  %s3429_s3 = inlined_call_operand.vmem [shape: f32[1,32], index: 3, kind: input, shape index: {}]   ;;  %s3430_s4 = inlined_call_operand.hbm [shape: f32[32,32], index: 4, kind: input, shape index: {}]   ;;  %s3431_s5 = inlined_call_operand.vmem [shape: f32[1,32], index: 5, kind: input, shape index: {}]   ;;  %s3432_s6 = inlined_call_operand.hbm [shape: f32[32,32], index: 6, kind: input, shape index: {}]   ;;  %s3433_s7 = inlined_call_operand.vmem [shape: f32[1,32], index: 7, kind: input, shape index: {}]   ;;  %s3434_s8 = inlined_call_operand.hbm [shape: f32[32,32], index: 8, kind: input, shape index: {}]   ;;  %s3435_s9 = inlined_call_operand.vmem [shape: f32[1,32], index: 9, kind: input, shape index: {}]   ;;  %s3436_s10 = inlined_call_operand.hbm [shape: f32[32,64], index: 10, kind: input, shape index: {}]   ;;  %s3437_s11 = inlined_call_operand.vmem [shape: f32[1,64], index: 11, kind: input, shape index: {}]   ;;  %s3438_s12 = inlined_call_operand.vmem [shape: f32[64,32], index: 12, kind: input, shape index: {}]   ;;  %s3439_s13 = inlined_call_operand.vmem [shape: f32[1,32], index: 13, kind: input, shape index: {}]   ;;  %s3440_s14 = inlined_call_operand.vmem [shape: f32[1,32], index: 14, kind: input, shape index: {}]   ;;  %s3441_s15 = inlined_call_operand.vmem [shape: f32[1,32], index: 15, kind: input, shape index: {}]   ;;  %s3442_s16 = inlined_call_operand.vmem [shape: f32[1,32], index: 16, kind: input, shape index: {}]   ;;  %s3443_s17 = inlined_call_operand.vmem [shape: f32[1,32], index: 17, kind: input, shape index: {}]   ;;  %s3444_s18 = inlined_call_operand.hbm [shape: f32[2,16,32], index: 18, kind: output, shape index: {}]  }
   0x1   :  { %3464 = sst [smem:[#allocation27_spill]] %s3426_s0 }
   0x2   :  { %3465 = sst [smem:[#allocation28_spill]] %s3427_s1 }
   0x3   :  { %3466 = sst [smem:[#allocation29_spill]] %s3428_s2 }
   0x4   :  { %3467 = sst [smem:[#allocation30_spill]] %s3429_s3 }
   0x5   :  { %3468 = sst [smem:[#allocation31_spill]] %s3437_s11 }
   0x6   :  { %3469 = sst [smem:[#allocation32_spill]] %s3438_s12 }
   0x7   :  { %3470 = sst [smem:[#allocation33_spill]] %s3439_s13 }
   0x8   :  { %3471 = sst [smem:[#allocation34_spill]] %s3442_s16 }
   0x9   :  { %3472 = sst [smem:[#allocation35_spill]] %s3443_s17 }
   0xa   :  { %3473 = sst [smem:[#allocation36_spill]] %s3444_s18 }
   0xb   :  { %23 = vsyncpa [#allocation5], 0 }
   0xc   :  { %24 = vsyncpa [#allocation8], 0 }
   0xd   :  { %25 = vsyncpa [#allocation11], 0 }
   0xe   :  { %26 = vsyncpa [#allocation6], 0 }
   0xf   :  { %28 = vsyncpa [#allocation6 + $0x1], 0  ;;  %s2972_s27 = smov 0   ;;  %s2974_s28 = smov 0  }
  0x10   :  { %s2976_s29 = smov 0   ;;  %s2978_s30 = smov 0  }
  0x11   :  { %s2980_s0 = smov 0   ;;  %s2982_s19 = smov 0  }
  0x12   :  { %s2984_s1 = smov 0   ;;  %s2986_s20 = smov 0  }
  0x13 LB: > { %3474 = sst [smem:[#allocation17_spill]] %s2828_s27  ;;  %s2167_s21 = sadd.s32 4294967295, %s2856_s20   ;;  %s2856_s20 = sphi %s2986_s20, %s34_s20   ;;  %s2852_s1 = sphi %s2984_s1, %s3521_s1   ;;  %s2848_s19 = sphi %s2982_s19, %s3517_s19   ;;  %s2844_s0 = sphi %s2980_s0, %s3516_s0   ;;  %s2840_s30 = sphi %s2978_s30, %s3515_s30   ;;  %s2836_s29 = sphi %s2976_s29, %s3514_s29   ;;  %s2832_s28 = sphi %s2974_s28, %s3520_s28   ;;  %s2828_s27 = sphi %s2972_s27, %s3519_s27  }
  0x14   : > { %3475 = sst [smem:[#allocation18_spill]] %s2836_s29  ;;  %s2168_s22 = sadd.s32 4294967294, %s2856_s20  }
  0x15   : > { %3476 = sst [smem:[#allocation19_spill]] %s2848_s19  ;;  %s43_s2 = sadd.s32 1, %s2848_s19 }
  0x16   : > { %3477 = sst [smem:[#allocation20_spill]] %s2852_s1  ;;  %s46_s23 = sadd.s32 1, %s2852_s1 }
  0x17   : > { %3478 = sst [smem:[#allocation21_spill]] %s2856_s20  ;;  %p44_p0 = scmp.ge.s32.totalorder %s43_s2, 2 }
  0x18   : > { %s445_s24 = sadd.s32 1, %s2836_s29  ;;  %p455_p1 = scmp.ne.s32.totalorder %s2836_s29, %s2832_s28 }
  0x19   : > { %p456_p2 = scmp.eq.s32.totalorder %s2167_s21, 3  ;;  %s3523_s2 = smov (%p44_p0, %s43_s2), 0 }
  0x1a   : > { %3479 = sst [smem:[#allocation22_spill]] %s3523_s2  ;;  %s3525_s23 = smov (!%p44_p0, %s46_s23), %s2852_s1 }
  0x1b   : > { %s441_s25 = ssub.s32 %s2848_s19, %s3523_s2  ;;  %p3024_p3 = por %p456_p2, %p455_p1 }
  0x1c   : > { %p48_p4 = scmp.ge.s32.totalorder %s3525_s23, 2  ;;  %p461_p5 = scmp.ne.s32.totalorder %s2832_s28, %s2828_s27 }
  0x1d   : > { %s3480_s26 = scalar_select %p3024_p3, 1, 0 }
  0x1e   : > { %p462_p6 = scmp.eq.s32.totalorder %s2168_s22, 3  ;;  %p2169_p7 = scmp.ge.s32.totalorder %s2856_s20, 1 }
  0x1f   : > { %3481 = sst [smem:[#allocation23_spill]] %s3480_s26  ;;  %s3527_s23 = smov (%p48_p4, %s3525_s23), 0 }
  0x20   : > { %3482 = sst [smem:[#allocation24_spill]] %s3527_s23  ;;  %p3033_p8 = por %p462_p6, %p461_p5 }
  0x21   : > { %p469_p9 = scmp.lt.s32.totalorder %s2856_s20, 5  ;;  %s440_s17 = ssub.s32 %s2852_s1, %s3527_s23 }
  0x22   : > { %s3483_s18 = scalar_select %p3033_p8, 1, 0 }
  0x23   : > { %s442_s16 = sor.u32 %s441_s25, %s440_s17  ;;  %p3040_p10 = pnand %p2169_p7, %p469_p9 }
  0x24   : > { %3484 = sst [smem:[#allocation25_spill]] %s3483_s18  ;;  %p443_p11 = scmp.eq.s32.totalorder %s442_s16, 0 }
  0x25   : > { %s3485_s2 = scalar_select %p3040_p10, 1, 0 }
  0x26   : > { %p3044_p12 = scmp.eq.s32.totalorder %s2167_s21, 0  ;;  %p2508_p13 = pneg %p3040_p10 }
  0x27   : > { %s3051_s22 = scalar_select %p443_p11, %s2836_s29, %s445_s24  }
  0x28   : > { %s3486_s19 = scalar_select %p3044_p12, 1, 0 }
  0x29   : > { %3487 = sst [smem:[#allocation26_spill]] %s3051_s22  ;;  %p3055_p0 = pnand %p3044_p12, %p2508_p13 }
  0x2a   : > { %s2858_s17 = smov [#allocation7]   ;;  %s2638_s21 = scalar_lea.hbm %s3432_s6, 512 }
  0x2b   : > { %s503_s25 = sshll.u32 %s2858_s17, 4  ;;  %p2639_p1 = scmp.ne.s32.totalorder %s3432_s6, %s2638_s21  ;;  %s504_s25 = int_to_ptr.vmem [resolvable:$true] %s503_s25 }
  0x2c   : > { %p3067_p2 = pneg %p3055_p0  ;;  %p2645_p6 = scmp.lt.u32.totalorder %s2638_s21, %s3432_s6 }
  0x2e   : > { %p2641_p4 = pnand %p3067_p2, %p2639_p1 }
  0x30   : > { %p2642_p5 = pneg %p2641_p4 }
  0x32   : > { %p2647_p7 = pnand %p2645_p6, %p2642_p5 }
  0x34   : > { %2650 = shalt.err (!%p2647_p7)
}
  0x35   : > { %s2651_s23 = scalar_lea.vmem %s504_s25, 512  ;;  %p2659_p8 = scmp.lt.s32.totalorder %s504_s25, %s504_s25 }
  0x36   : > { %p2652_p9 = scmp.ne.s32.totalorder %s504_s25, %s2651_s23  ;;  %p2660_p3 = scmp.lt.s32.totalorder %s2651_s23, %s2651_s23 }
  0x38   : > { %p2654_p11 = pnand %p2652_p9, %p3067_p2  ;;  %p2661_p12 = por %p2660_p3, %p2659_p8 }
  0x3a   : > { %p2655_p13 = pneg %p2654_p11 }
  0x3c   : > { %p2662_p10 = pnand %p2661_p12, %p2655_p13 }
  0x3e   : > { %2665 = shalt.err (!%p2662_p10)
}
  0x3f   : > { %s2859_s27 = smov 128   ;;  %s2860_s1 = smov 8  }
  0x40   : > { %2514 = dma.hbm_to_vmem [thread:$0]  (!%p3055_p0), %s3432_s6, 512, %s504_s25, [#allocation8], %s2859_s27, %s2859_s27, %s2860_s1  }
  0x41   : > { %s2861_s21 = smov [#allocation4]   ;;  %s2862_s29 = smov [#allocation9]  }
  0x42   : > { %s487_s17 = sshll.u32 %s2861_s21, 4  ;;  %s519_s20 = sshll.u32 %s2862_s29, 4  ;;  %s488_s17 = int_to_ptr.vmem [resolvable:$true] %s487_s17  ;;  %s3086_s20 = int_to_ptr.vmem [resolvable:$true] %s519_s20 }
  0x43   : > { %s2666_s13 = scalar_lea.hbm %s3430_s4, 512 }
  0x44   : > { %p2667_p3 = scmp.ne.s32.totalorder %s3430_s4, %s2666_s13  ;;  %p2673_p12 = scmp.lt.u32.totalorder %s2666_s13, %s3430_s4 }
  0x46   : > { %p2669_p8 = pnand %p2667_p3, %p3067_p2 }
  0x48   : > { %p2670_p10 = pneg %p2669_p8 }
  0x4a   : > { %p2675_p1 = pnand %p2673_p12, %p2670_p10 }
  0x4c   : > { %2678 = shalt.err (!%p2675_p1)
}
  0x4d   : > { %s2679_s29 = scalar_lea.vmem %s488_s17, 512  ;;  %p2687_p7 = scmp.lt.s32.totalorder %s488_s17, %s488_s17 }
  0x4e   : > { %p2680_p4 = scmp.ne.s32.totalorder %s488_s17, %s2679_s29  ;;  %p2688_p9 = scmp.lt.s32.totalorder %s2679_s29, %s2679_s29 }
  0x50   : > { %p2682_p5 = pnand %p2680_p4, %p3067_p2  ;;  %p2689_p11 = por %p2688_p9, %p2687_p7 }
  0x52   : > { %p2683_p6 = pneg %p2682_p5 }
  0x54   : > { %p2690_p13 = pnand %p2689_p11, %p2683_p6 }
  0x56   : > { %2693 = shalt.err (!%p2690_p13)
}
  0x57   : > { %2511 = dma.hbm_to_vmem [thread:$0]  (!%p3055_p0), %s3430_s4, 512, %s488_s17, [#allocation5], %s2859_s27, %s2859_s27, %s2860_s1  }
  0x58   : > { %s2694_s16 = scalar_lea.hbm %s3434_s8, 512 }
  0x59   : > { %p2695_p3 = scmp.ne.s32.totalorder %s3434_s8, %s2694_s16  ;;  %p2701_p12 = scmp.lt.u32.totalorder %s2694_s16, %s3434_s8 }
  0x5b   : > { %p2697_p8 = pnand %p2695_p3, %p3067_p2 }
  0x5d   : > { %p2698_p10 = pneg %p2697_p8 }
  0x5f   : > { %p2703_p1 = pnand %p2701_p12, %p2698_p10 }
  0x61   : > { %2706 = shalt.err (!%p2703_p1)
}
  0x62   : > { %s2707_s17 = scalar_lea.vmem %s3086_s20, 512  ;;  %p2715_p7 = scmp.lt.s32.totalorder %s3086_s20, %s3086_s20 }
  0x63   : > { %p2708_p4 = scmp.ne.s32.totalorder %s3086_s20, %s2707_s17  ;;  %p2716_p9 = scmp.lt.s32.totalorder %s2707_s17, %s2707_s17 }
  0x65   : > { %p2710_p5 = pnand %p2708_p4, %p3067_p2  ;;  %p2717_p11 = por %p2716_p9, %p2715_p7 }
  0x67   : > { %p2711_p6 = pneg %p2710_p5 }
  0x69   : > { %p2718_p13 = pnand %p2717_p11, %p2711_p6 }
  0x6b   : > { %2721 = shalt.err (!%p2718_p13)
}
  0x6c   : > { %2517 = dma.hbm_to_vmem [thread:$0]  (!%p3055_p0), %s3434_s8, 512, %s3086_s20, [#allocation8], %s2859_s27, %s2859_s27, %s2860_s1  }
  0x6d   : > { %s2863_s12 = smov [#allocation10]   ;;  %s2722_s21 = scalar_lea.hbm %s3436_s10, 512 }
  0x6e   : > { %s535_s13 = sshll.u32 %s2863_s12, 4  ;;  %p2723_p3 = scmp.ne.s32.totalorder %s3436_s10, %s2722_s21  ;;  %s536_s13 = int_to_ptr.vmem [resolvable:$true] %s535_s13 }
  0x6f   : > { %p2729_p12 = scmp.lt.u32.totalorder %s2722_s21, %s3436_s10 }
  0x70   : > { %p2725_p8 = pnand %p2723_p3, %p3067_p2 }
  0x72   : > { %p2726_p10 = pneg %p2725_p8 }
  0x74   : > { %p2731_p1 = pnand %p2729_p12, %p2726_p10 }
  0x76   : > { %2734 = shalt.err (!%p2731_p1)
}
  0x77   : > { %s2735_s20 = scalar_lea.vmem %s536_s13, 512  ;;  %p2743_p7 = scmp.lt.s32.totalorder %s536_s13, %s536_s13 }
  0x78   : > { %p2736_p4 = scmp.ne.s32.totalorder %s536_s13, %s2735_s20  ;;  %p2744_p9 = scmp.lt.s32.totalorder %s2735_s20, %s2735_s20 }
  0x7a   : > { %p2738_p5 = pnand %p2736_p4, %p3067_p2  ;;  %p2745_p11 = por %p2744_p9, %p2743_p7 }
  0x7c   : > { %p2739_p6 = pneg %p2738_p5 }
  0x7e   : > { %p2746_p13 = pnand %p2745_p11, %p2739_p6 }
  0x80   : > { %2749 = shalt.err (!%p2746_p13)
}
  0x81   : > { %2520 = dma.hbm_to_vmem [thread:$0]  (!%p3055_p0), %s3436_s10, 512, %s536_s13, [#allocation11], %s2859_s27, %s2859_s27, %s2860_s1  }
  0x82   : > { %p3490_p3 = scmp.ne.s32.totalorder %s3485_s2, 0 }
  0x83   : > { %p3491_p2 = scmp.ne.s32.totalorder (!%p3490_p3), %s3486_s19, 0 }
  0x84   : > { %591 = sbr.rel (%p3490_p3) target bundleno = 3025 (0xbd1), region = 92 }
  0x8b   : > { %2811 = dma.done.wait (%p3491_p2), [#allocation5], 512  }
  0x8c   : > { %2813 = vsyncadd (%p3491_p2), [#allocation5], 4294966784 }
  0x8d   : > { %2815 = dma.done.wait (%p3491_p2), [#allocation8], 1024  }
  0x8e   : > { %2817 = vsyncadd (%p3491_p2), [#allocation8], 4294966272 }
  0x8f   : > { %2819 = dma.done.wait (%p3491_p2), [#allocation11], 512  }
  0x90   : > { %2821 = vsyncadd (%p3491_p2), [#allocation11], 4294966784  ;;  %s3463_s18 = sand.u32 1, %s2832_s28   ;;  %p665_p0 = scmp.lt.s32.totalorder %s2844_s0, 1 }
  0x91   : > { %s3174_s2 = sshll.u32 %s3463_s18, 3  ;;  %p667_p8 = scmp.lt.s32.totalorder %s2840_s30, 1 }
  0x92   : > { %s666_s24 = scalar_select %p665_p0, %s2844_s0, 1 }
  0x93   : > { %s668_s27 = scalar_select %p667_p8, %s2840_s30, 1 }
  0x94   : > { %s2181_s1 = sshll.u32 %s666_s24, 1  ;;  %s2225_s12 = sshll.u32 %s666_s24, 4 }
  0x95   : > { %s670_s13 = sadd.s32 %s2181_s1, %s668_s27  ;;  %s3492_s16 = sld [smem:[#allocation28_spill]] }
  0x96   : > { %s2182_s23 = sshll.u32 %s670_s13, 3  ;;  %s3493_s17 = sld [smem:[#allocation27_spill]] }
  0x97   : > { %s664_s29 = scalar_lea.vmem [#allocation12], %s3174_s2  ;;  %p2185_p10 = scmp.ne.s32.totalorder %s2840_s30, 0 }
  0x98   : > { %v684_v0 = vld [vmem:[#allocation4] sm:$0xff] (!%p2185_p10)  ;;  %v685_v1 = vld [vmem:[#allocation4 + $0x8] sm:$0xff] (!%p2185_p10)  ;;  %v686_v2 = vld [vmem:[#allocation4 + $0x10] sm:$0xff] (!%p2185_p10)  ;;  %vm695_vm0 = vcmask (!%p2185_p10), 261120   ;;  %vm883_vm1 = vcmask (!%p2185_p10), 64512   ;;  %s2865_s13 = smov (!%p2185_p10), 120  }
  0x99   : > { %681 = sbr.rel (%p2185_p10) target bundleno = 513 (0x201), region = 112  ;;  %v2416_v3 = vpack.c.bf16 (!%p2185_p10), %v685_v1, %v684_v0  ;;  %v687_v4 = vld [vmem:[#allocation4 + $0x18] sm:$0xff] (!%p2185_p10)  ;;  %v777_v6 = vld [vmem:[#allocation7] sm:$0xff] (!%p2185_p10)  ;;  %v778_v8 = vld [vmem:[#allocation7 + $0x8] sm:$0xff] (!%p2185_p10)  ;;  %s2866_s19 = smov (!%p2185_p10), 104  }
  0x9a   : > { %v2420_v7 = vpack.c.bf16 (!%p2185_p10), %v687_v4, %v686_v2  ;;  %v779_v9 = vld [vmem:[#allocation7 + $0x10] sm:$0xff] (!%p2185_p10)  ;;  %v2424_v10 = vpack.c.bf16 (!%p2185_p10), %v778_v8, %v777_v6  ;;  %v780_v11 = vld [vmem:[#allocation7 + $0x18] sm:$0xff] (!%p2185_p10)  ;;  %v2186_v14 = vld [vmem:[%s3431_s5] ss:$0 sm:$0xff] (!%p2185_p10) }
  0x9b   : > { %s677_s21 = scalar_lea.vmem %s3492_s16, %s2225_s12  ;;  %2417 = vmatprep.subr.bf16.mxu0 (!%p2185_p10), %v2416_v3  ;;  %v2428_v12 = vpack.c.bf16 (!%p2185_p10), %v780_v11, %v779_v9  ;;  %v2189_v16 = vld [vmem:[%s3433_s7] ss:$0 sm:$0xff] (!%p2185_p10)  ;;  %s2864_s12 = smov (!%p2185_p10), 112  }
  0x9c   : > { %s3185_s20 = scalar_lea.vmem %s3493_s17, %s2182_s23  ;;  %v682_v5 = vld [vmem:[%s677_s21] sm:$0xff] (!%p2185_p10)  ;;  %2419 = vmatpush3.bf16.msra.mxu0 (!%p2185_p10), %v2416_v3  ;;  %2425 = vmatprep.subr.bf16.mxu1 (!%p2185_p10), %v2424_v10  ;;  %v683_v13 = vld [vmem:[%s677_s21 + $0x8] sm:$0xff] (!%p2185_p10) }
  0x9d   : > { %2294 = vmatprep.mubr.msk.f32.mxu0 (!%p2185_p10), %vm695_vm0, %v682_v5  ;;  %2305 = vmatprep.mubr.msk.f32.mxu1 (!%p2185_p10), %vm695_vm0, %v682_v5 }
  0x9e   : > { %2421 = vmatprep.subr.bf16.mxu0 (!%p2185_p10), %v2420_v7  ;;  %2427 = vmatpush3.bf16.msra.mxu1 (!%p2185_p10), %v2424_v10 }
  0x9f   : > { %2429 = vmatprep.subr.bf16.mxu1 (!%p2185_p10), %v2428_v12 }
  0xa0   : > { %2423 = vmatpush3.bf16.msra.mxu0 %v2420_v7 }
  0xa2   : > { %2431 = vmatpush3.bf16.msra.mxu1 %v2428_v12 }
  0xa3   : > { %2295 = vmatmul.mubr.msk.f32.vlgmr.msra.gmra.mrb[0].mxu0 %vm695_vm0, %v683_v13 }
  0xa5   : > { %2306 = vmatmul.mubr.msk.f32.vlgmr.msra.gmra.mrb[0].mxu1 %vm695_vm0, %v683_v13 }
 0x176   : > { %v2296_v15 = vpop.f32.mrb[0].mxu0 }
 0x177   : > { %v774_v17 = vadd.f32 %v2296_v15, %v2186_v14  ;;  %v768_v18 = vpop.f32.mrb[1].mxu0 }
 0x178   : > { %v769_v19 = vadd.f32 %v2186_v14, %v768_v18  ;;  %v2307_v20 = vpop.f32.mrb[0].mxu1 }
 0x179   : > { %885 = vst.msk [vmem:[#allocation2 + $0x8] sm:$0xff] %vm883_vm1, %v774_v17  ;;  %873 = vrot.lane.b32.xlu1 %v774_v17, %s2864_s12  ;;  %867 = vrot.lane.b32.xlu0 %v774_v17, %s2865_s13  ;;  %v860_v21 = vadd.f32 %v2307_v20, %v2189_v16  ;;  %v854_v22 = vpop.f32.mrb[1].mxu1 }
 0x17a   : > { %884 = vst.msk [vmem:[#allocation2] sm:$0xff] %vm883_vm1, %v769_v19  ;;  %v855_v23 = vadd.f32 %v2189_v16, %v854_v22 }
 0x17b   : > { %913 = vst.msk [vmem:[#allocation3 + $0x8] sm:$0xff] %vm883_vm1, %v860_v21 }
 0x17c   : > { %912 = vst.msk [vmem:[#allocation3] sm:$0xff] %vm883_vm1, %v855_v23 }
 0x17d   : > { %879 = vrot.lane.b32.xlu1 %v774_v17, %s2866_s19  ;;  %865 = vrot.lane.b32.xlu0 %v769_v19, %s2865_s13 }
 0x181   : > { %896 = vrot.lane.b32.xlu1 %v860_v21, %s2865_s13  ;;  %877 = vrot.lane.b32.xlu0 %v769_v19, %s2866_s19 }
 0x185   : > { %902 = vrot.lane.b32.xlu1 %v860_v21, %s2864_s12  ;;  %894 = vrot.lane.b32.xlu0 %v855_v23, %s2865_s13 }
 0x189   : > { %871 = vrot.lane.b32.xlu1 %v769_v19, %s2864_s12  ;;  %900 = vrot.lane.b32.xlu0 %v855_v23, %s2864_s12 }
 0x18d   : > { %908 = vrot.lane.b32.xlu1 %v860_v21, %s2866_s19  ;;  %906 = vrot.lane.b32.xlu0 %v855_v23, %s2866_s19 }
 0x1eb   : > { %v874_v24 = vpop.permute.xlu1 %873  ;;  %v868_v25 = vpop.permute.xlu0 %867 }
 0x1ec   : > { %889 = vst.msk [vmem:[#allocation2 + $0x28] sm:$0xff] %vm883_vm1, %v874_v24  ;;  %887 = vst.msk [vmem:[#allocation2 + $0x18] sm:$0xff] %vm883_vm1, %v868_v25 }
 0x1ef   : > { %v880_v26 = vpop.permute.xlu1 %879  ;;  %v866_v27 = vpop.permute.xlu0 %865 }
 0x1f0   : > { %891 = vst.msk [vmem:[#allocation2 + $0x38] sm:$0xff] %vm883_vm1, %v880_v26  ;;  %886 = vst.msk [vmem:[#allocation2 + $0x10] sm:$0xff] %vm883_vm1, %v866_v27 }
 0x1f3   : > { %v897_v28 = vpop.permute.xlu1 %896  ;;  %v878_v29 = vpop.permute.xlu0 %877 }
 0x1f4   : > { %915 = vst.msk [vmem:[#allocation3 + $0x18] sm:$0xff] %vm883_vm1, %v897_v28  ;;  %890 = vst.msk [vmem:[#allocation2 + $0x30] sm:$0xff] %vm883_vm1, %v878_v29 }
 0x1f7   : > { %v903_v30 = vpop.permute.xlu1 %902  ;;  %v895_v31 = vpop.permute.xlu0 %894 }
 0x1f8   : > { %917 = vst.msk [vmem:[#allocation3 + $0x28] sm:$0xff] %vm883_vm1, %v903_v30  ;;  %914 = vst.msk [vmem:[#allocation3 + $0x10] sm:$0xff] %vm883_vm1, %v895_v31 }
 0x1fb   : > { %v872_v32 = vpop.permute.xlu1 %871  ;;  %v901_v33 = vpop.permute.xlu0 %900 }
 0x1fc   : > { %888 = vst.msk [vmem:[#allocation2 + $0x20] sm:$0xff] %vm883_vm1, %v872_v32  ;;  %916 = vst.msk [vmem:[#allocation3 + $0x20] sm:$0xff] %vm883_vm1, %v901_v33 }
 0x1ff   : > { %v909_v34 = vpop.permute.xlu1 %908  ;;  %v907_v35 = vpop.permute.xlu0 %906 }
 0x200   : > { %919 = vst.msk [vmem:[#allocation3 + $0x38] sm:$0xff] %vm883_vm1, %v909_v34  ;;  %918 = vst.msk [vmem:[#allocation3 + $0x30] sm:$0xff] %vm883_vm1, %v907_v35 }
 0x201 PF: > { %s3494_s21 = sld [smem:[#allocation29_spill]]  ;;  %v2867_v39 = vmov 0.0|0.0   ;;  %vm2868_vm2 = vmmov 0   ;;  %v2869_v42 = vmov 0.0   ;;  %v3235_v44 = vld [vmem:[%s3185_s20] sm:$0xff]  ;;  %vm932_vm3 = vcmask 261120  }
 0x202   : > { %2432 = vmatprep.subr.bf16.mxu1 %v2867_v39  ;;  %2316 = vmatprep.mubr.msk.f32.mxu1 %vm2868_vm2, %v2869_v42  ;;  %v1014_v45 = vld [vmem:[#allocation2] sm:$0xff]  ;;  %v1015_v46 = vld [vmem:[#allocation2 + $0x8] sm:$0xff]  ;;  %vm1022_vm4 = vcmask 64512   ;;  %v1016_v49 = vld [vmem:[#allocation2 + $0x10] sm:$0xff]  ;;  %s3497_s3 = sld [smem:[#allocation30_spill]]  ;;  %s2870_s1 = smov 104  }
 0x203   : > { %2442 = vmatprep.subr.bf16.mxu0 %v2867_v39  ;;  %2330 = vmatprep.mubr.msk.f32.mxu0 %vm2868_vm2, %v2869_v42  ;;  %v2439_v47 = vpack.c.bf16 %v1015_v46, %v1014_v45  ;;  %vm3244_vm5 = vmpackc.low %vm1022_vm4, %vm1022_vm4  ;;  %v1017_v50 = vld [vmem:[#allocation2 + $0x18] sm:$0xff]  ;;  %v1018_v54 = vld [vmem:[#allocation2 + $0x20] sm:$0xff]  ;;  %s2871_s12 = smov 120   ;;  %s2872_s13 = smov 112   ;;  %vm1335_vm6 = vcmask 130048   ;;  %vm1694_vm7 = vcmask 195584  }
 0x204   : > { %v2443_v51 = vpack.c.bf16 %v1017_v50, %v1016_v49  ;;  %v1019_v55 = vld [vmem:[#allocation2 + $0x28] sm:$0xff]  ;;  %v1020_v60 = vld [vmem:[#allocation2 + $0x30] sm:$0xff]  ;;  %v1021_v61 = vld [vmem:[#allocation2 + $0x38] sm:$0xff]  ;;  %s2873_s19 = smov 8   ;;  %s2874_s26 = smov 16   ;;  %vm1915_vm8 = vcmask 523264  }
 0x205   : > { %v2447_v59 = vpack.c.bf16 %v1019_v55, %v1018_v54  ;;  %v2451_v62 = vpack.c.bf16 %v1021_v61, %v1020_v60  ;;  %v1380_v19 = vld [vmem:[#allocation3] sm:$0xff]  ;;  %v1381_v20 = vld [vmem:[#allocation3 + $0x8] sm:$0xff]  ;;  %v1383_v45 = vld [vmem:[#allocation3 + $0x18] sm:$0xff]  ;;  %s2875_s16 = smov 24   ;;  %s3501_s25 = sld [smem:[#allocation33_spill]] }
 0x206   : > { %2445 = vmatpush3.bf16.xpose.msk.msra.mxu0 %vm3244_vm5, %v2443_v51  ;;  %v2455_v21 = vpack.c.bf16 %v1381_v20, %v1380_v19  ;;  %s2221_s17 = sshll.u32 %s2844_s0, 1  ;;  %s3502_s11 = sld [smem:[#allocation23_spill]] }
 0x207   : > { %v921_v36 = vld [vmem:[%s3494_s21] sm:$0xff]  ;;  %v922_v37 = vld [vmem:[%s3494_s21 + $0x8] sm:$0xff]  ;;  %v923_v38 = vld [vmem:[%s3494_s21 + $0x10] sm:$0xff]  ;;  %2450 = vmatprep.subr.bf16.mxu0 %v2867_v39  ;;  %s2032_s24 = sadd.s32 %s2840_s30, %s2221_s17  ;;  %s2036_s23 = sshll.u32 %s664_s29, 4  ;;  %s3370_s23 = int_to_ptr.vmem [resolvable:$true] %s2036_s23 }
 0x208   : > { %v2433_v40 = vpack.c.bf16 %v922_v37, %v921_v36  ;;  %v924_v41 = vld [vmem:[%s3494_s21 + $0x18] sm:$0xff]  ;;  %v2192_v52 = vld [vmem:[%s3497_s3] ss:$0 sm:$0xff]  ;;  %s3505_s0 = sld [smem:[#allocation36_spill]]  ;;  %s3507_s30 = sand.u32 1, %s2832_s28  }
 0x209   : > { %v2436_v43 = vpack.c.bf16 %v924_v41, %v923_v38  ;;  %v1384_v37 = vld [vmem:[#allocation3 + $0x20] sm:$0xff]  ;;  %v1385_v38 = vld [vmem:[#allocation3 + $0x28] sm:$0xff]  ;;  %s2021_s17 = scalar_lea.sflag [#allocation6], %s3507_s30  ;;  %s2876_s20 = smov [#allocation12]  }
 0x20a   : > { %2434 = vmatpush3.bf16.msra.mxu1 %v2433_v40  ;;  %v2461_v41 = vpack.c.bf16 %v1385_v38, %v1384_v37  ;;  %v2213_v38 = vld [vmem:[%s3441_s15] ss:$0 sm:$0xff]  ;;  %s2754_s27 = sshll.u32 %s2876_s20, 4  ;;  %s2755_s27 = int_to_ptr.vmem [resolvable:$false] %s2754_s27 }
 0x20b   : > { %2435 = vmatprep.subr.bf16.mxu1 %v2867_v39  ;;  %p2757_p6 = scmp.lt.s32.totalorder %s3370_s23, %s2755_s27 }
 0x20c   : > { %p3508_p1 = scmp.ne.s32.totalorder %s3502_s11, 0 }
 0x20e   : > { %2437 = vmatpush3.bf16.msra.mxu1 %v2436_v43  ;;  %v1382_v43 = vld [vmem:[#allocation3 + $0x10] sm:$0xff]  ;;  %s3506_s18 = smov %s3505_s0 }
 0x20f   : > { %2438 = vmatprep.subr.bf16.mxu1 %v2867_v39 }
 0x211   : > { %2317 = vmatmul.mubr.msk.f32.vlgmr.msra.gmra.mrb[0].mxu1 %vm932_vm3, %v3235_v44 }
 0x212   : > { %2323 = vmatprep.mubr.msk.f32.mxu1 %vm2868_vm2, %v2869_v42 }
 0x217   : > { %2441 = vmatpush3.bf16.xpose.msk.msra.mxu1 %vm3244_vm5, %v2439_v47  ;;  %v2458_v47 = vpack.c.bf16 %v1383_v45, %v1382_v43 }
 0x218   : > { %2446 = vmatprep.subr.bf16.mxu1 %v2867_v39 }
 0x2e4   : > { %v1002_v53 = vpop.f32.mrb[0].mxu1 }
 0x2e5   : > { %v1003_v56 = vadd.f32 %v2192_v52, %v1002_v53  ;;  %v2318_v57 = vpop.f32.mrb[1].mxu1  ;;  %v1386_v52 = vld [vmem:[#allocation3 + $0x30] sm:$0xff]  ;;  %v1387_v53 = vld [vmem:[#allocation3 + $0x38] sm:$0xff] }
 0x2e6   : > { %v2464_v55 = vpack.c.bf16 %v1387_v53, %v1386_v52 }
 0x2e7   : > { %v1006_v58 = vmul.f32 0.35355338, %v1003_v56 }
 0x2e9   : > { %1012 = vrot.lane.b32.xlu1 %v1006_v58, %s2870_s1  ;;  %1008 = vrot.lane.b32.xlu0 %v1006_v58, %s2871_s12  ;;  %s3498_s1 = sld [smem:[#allocation32_spill]] }
 0x2ea   : > { %2324 = vmatmul.mubr.msk.f32.vlgmr.msra.gmra.mrb[2].mxu1 %vm1022_vm4, %v1006_v58 }
 0x2eb   : > { %2449 = vmatpush3.bf16.xpose.msk.msra.mxu1 %vm3244_vm5, %v2447_v59  ;;  %2337 = vmatprep.mubr.msk.f32.mxu1 %vm2868_vm2, %v2869_v42 }
 0x2ec   : > { %2454 = vmatprep.subr.bf16.mxu1 %v2867_v39 }
 0x2ed   : > { %1010 = vrot.lane.b32.xlu0 %v1006_v58, %s2872_s13 }
 0x2ef   : > { %s3499_s12 = smov %s3498_s1  ;;  %v1900_v43 = vld [vmem:[%s3498_s1] sm:$0xff]  ;;  %s3503_s1 = sld [smem:[#allocation34_spill]] }
 0x2f0   : > { %v1901_v45 = vld [vmem:[%s3499_s12 + $0x8] sm:$0xff]  ;;  %v1906_v53 = vld [vmem:[%s3499_s12 + $0x30] sm:$0xff] }
 0x35b   : > { %v1009_v63 = vpop.permute.xlu0 %1008  ;;  %v1013_v1 = vpop.permute.xlu1 %1012 }
 0x35c   : > { %2331 = vmatmul.mubr.msk.f32.vlgmr.msra.gmra.mrb[0].mxu0 %vm1022_vm4, %v1009_v63  ;;  %v1696_v63 = vld [vmem:[#allocation9] sm:$0xff] }
 0x35d   : > { %2453 = vmatpush3.bf16.xpose.msk.msra.mxu0 %vm3244_vm5, %v2451_v62  ;;  %2344 = vmatprep.mubr.msk.f32.mxu0 %vm2868_vm2, %v2869_v42 }
 0x35e   : > { %2460 = vmatprep.subr.bf16.mxu0 %v2867_v39 }
 0x35f   : > { %v1011_v0 = vpop.permute.xlu0 %1010 }
 0x360   : > { %2338 = vmatmul.mubr.msk.f32.vlgmr.msra.gmra.mrb[4].mxu1 %vm1022_vm4, %v1011_v0  ;;  %v1697_v0 = vld [vmem:[#allocation9 + $0x8] sm:$0xff] }
 0x361   : > { %2351 = vmatprep.mubr.msk.f32.mxu1 %vm2868_vm2, %v2869_v42  ;;  %2456 = vmatpush3.bf16.msra.mxu1 %v2455_v21 }
 0x362   : > { %2457 = vmatprep.subr.bf16.mxu1 %v2867_v39 }
 0x364   : > { %2345 = vmatmul.mubr.msk.f32.vlgmr.msra.gmra.mrb[2].mxu0 %vm1022_vm4, %v1013_v1  ;;  %v2467_v1 = vpack.c.bf16 %v1697_v0, %v1696_v63  ;;  %v2216_v0 = vld [vmem:[%s3501_s25] ss:$0 sm:$0xff] }
 0x365   : > { %2365 = vmatprep.mubr.msk.f32.mxu0 %vm2868_vm2, %v2869_v42  ;;  %2462 = vmatpush3.bf16.msra.mxu0 %v2461_v41 }
 0x366   : > { %2466 = vmatprep.subr.bf16.mxu0 %v2867_v39 }
 0x3bd   : > { %v1097_v2 = vpop.f32.mrb[2].mxu1 }
 0x3be   : > { %v2325_v3 = vpop.f32.mrb[3].mxu1  ;;  %v1336_v4 = vsel %vm1335_vm6, %v1097_v2, -inf }
 0x3bf   : > { %1337 = vmax.xlane.f32.xlu1 %v1336_v4  ;;  %v1699_v3 = vld [vmem:[#allocation9 + $0x18] sm:$0xff] }
 0x42f   : > { %v1175_v5 = vpop.f32.mrb[0].mxu0 }
 0x430   : > { %v2332_v6 = vpop.f32.mrb[1].mxu0  ;;  %v1339_v7 = vsel %vm1335_vm6, %v1175_v5, -inf }
 0x431   : > { %1340 = vmax.xlane.f32.xlu0 %v1339_v7 }
 0x433   : > { %v1253_v8 = vpop.f32.mrb[4].mxu1 }
 0x434   : > { %v2339_v9 = vpop.f32.mrb[5].mxu1  ;;  %v1342_v10 = vsel %vm1335_vm6, %v1253_v8, -inf }
 0x435   : > { %1343 = vmax.xlane.f32.xlu0 %v1342_v10 }
 0x437   : > { %v1331_v11 = vpop.f32.mrb[2].mxu0 }
 0x438   : > { %v2346_v12 = vpop.f32.mrb[3].mxu0  ;;  %v1345_v13 = vsel %vm1335_vm6, %v1331_v11, -inf }
 0x439   : > { %1346 = vmax.xlane.f32.xlu1 %v1345_v13 }
 0x44c   : > { %v1338_v14 = vpop.xlane.xlu1 %1337 }
 0x44d   : > { %v1348_v15 = vsub.f32 %v1097_v2, %v1338_v14  ;;  %v1698_v2 = vld [vmem:[#allocation9 + $0x10] sm:$0xff] }
 0x44e   : > { %v2470_v4 = vpack.c.bf16 %v1699_v3, %v1698_v2 }
 0x44f   : > { %v1352_v16 = vmul.f32 1.442695, %v1348_v15 }
 0x451   : > { %2616 = vpow2.f32 %v1352_v16 }
 0x45b   : > { %v2617_v17 = vpop.eup %2616 }
 0x45c   : > { %v1360_v18 = vsel %vm1335_vm6, %v2617_v17, 0.0 }
 0x45d   : > { %1361 = vadd.xlane.f32.xlu0 %v1360_v18 }
 0x4be   : > { %v1341_v22 = vpop.xlane.xlu0 %1340 }
 0x4bf   : > { %v1349_v23 = vsub.f32 %v1175_v5, %v1341_v22 }
 0x4c1   : > { %v1354_v24 = vmul.f32 1.442695, %v1349_v23 }
 0x4c2   : > { %v1344_v25 = vpop.xlane.xlu0 %1343 }
 0x4c3   : > { %2618 = vpow2.f32 %v1354_v24  ;;  %v1350_v26 = vsub.f32 %v1253_v8, %v1344_v25 }
 0x4c5   : > { %v1356_v27 = vmul.f32 1.442695, %v1350_v26 }
 0x4c6   : > { %v1347_v28 = vpop.xlane.xlu1 %1346 }
 0x4c7   : > { %2620 = vpow2.f32 %v1356_v27  ;;  %v1351_v29 = vsub.f32 %v1331_v11, %v1347_v28  ;;  %v1812_v28 = vld [vmem:[#allocation10 + $0x8] sm:$0xff] }
 0x4c9   : > { %v1358_v30 = vmul.f32 1.442695, %v1351_v29 }
 0x4cb   : > { %2622 = vpow2.f32 %v1358_v30  ;;  %v1813_v30 = vld [vmem:[#allocation10 + $0x10] sm:$0xff] }
 0x4cd   : > { %v2619_v31 = vpop.eup %2618 }
 0x4ce   : > { %v1363_v32 = vsel %vm1335_vm6, %v2619_v31, 0.0 }
 0x4cf   : > { %1364 = vadd.xlane.f32.xlu1 %v1363_v32 }
 0x4d1   : > { %v2621_v33 = vpop.eup %2620 }
 0x4d2   : > { %v1366_v34 = vsel %vm1335_vm6, %v2621_v33, 0.0 }
 0x4d3   : > { %1367 = vadd.xlane.f32.xlu0 %v1366_v34 }
 0x4d5   : > { %v2623_v35 = vpop.eup %2622 }
 0x4d6   : > { %v1369_v36 = vsel %vm1335_vm6, %v2623_v35, 0.0 }
 0x4d7   : > { %1370 = vadd.xlane.f32.xlu1 %v1369_v36  ;;  %v2212_v36 = vld [vmem:[%s3440_s14] ss:$0 sm:$0xff] }
 0x4ea   : > { %v1362_v40 = vpop.xlane.xlu0 %1361 }
 0x4eb   : > { %2624 = vrcp.f32 %v1362_v40 }
 0x4f5   : > { %v2625_v46 = vpop.eup %2624 }
 0x4f6   : > { %v1376_v48 = vmul.f32 %v2625_v46, %v2617_v17  ;;  %v2210_v17 = vld [vmem:[%s3435_s9] ss:$0 sm:$0xff]  ;;  %v2479_v46 = vpack.c.bf16 %v1901_v45, %v1900_v43 }
 0x4f8   : > { %2352 = vmatmul.mubr.msk.f32.vlgmr.msra.gmra.mrb[6].mxu1 %vm1335_vm6, %v1376_v48  ;;  %v1903_v48 = vld [vmem:[%s3499_s12 + $0x18] sm:$0xff] }
 0x4f9   : > { %2459 = vmatpush3.bf16.msra.mxu1 %v2458_v47  ;;  %2358 = vmatprep.mubr.msk.f32.mxu1 %vm2868_vm2, %v2869_v42  ;;  %v1902_v47 = vld [vmem:[%s3499_s12 + $0x10] sm:$0xff] }
 0x4fa   : > { %2463 = vmatprep.subr.bf16.mxu1 %v2867_v39 }
 0x55c   : > { %v1365_v49 = vpop.xlane.xlu1 %1364 }
 0x55d   : > { %2626 = vrcp.f32 %v1365_v49  ;;  %v2482_v49 = vpack.c.bf16 %v1903_v48, %v1902_v47 }
 0x560   : > { %v1368_v50 = vpop.xlane.xlu0 %1367 }
 0x561   : > { %2628 = vrcp.f32 %v1368_v50  ;;  %v1904_v50 = vld [vmem:[%s3499_s12 + $0x20] sm:$0xff] }
 0x564   : > { %v1371_v51 = vpop.xlane.xlu1 %1370 }
 0x565   : > { %2630 = vrcp.f32 %v1371_v51  ;;  %v1905_v51 = vld [vmem:[%s3499_s12 + $0x28] sm:$0xff] }
 0x566   : > { %v2485_v52 = vpack.c.bf16 %v1905_v51, %v1904_v50 }
 0x567   : > { %v2627_v54 = vpop.eup %2626 }
 0x568   : > { %v1377_v56 = vmul.f32 %v2627_v54, %v2619_v31  ;;  %v1814_v31 = vld [vmem:[#allocation10 + $0x18] sm:$0xff] }
 0x569   : > { %v2476_v32 = vpack.c.bf16 %v1814_v31, %v1813_v30  ;;  %v1907_v54 = vld [vmem:[%s3499_s12 + $0x38] sm:$0xff] }
 0x56a   : > { %2359 = vmatmul.mubr.msk.f32.vlgmr.msra.gmra.mrb[8].mxu1 %vm1335_vm6, %v1377_v56 }
 0x56b   : > { %v2629_v57 = vpop.eup %2628  ;;  %2465 = vmatpush3.bf16.msra.mxu1 %v2464_v55  ;;  %2372 = vmatprep.mubr.msk.f32.mxu1 %vm2868_vm2, %v2869_v42  ;;  %v2488_v55 = vpack.c.bf16 %v1907_v54, %v1906_v53 }
 0x56c   : > { %v1378_v58 = vmul.f32 %v2629_v57, %v2621_v33  ;;  %2472 = vmatprep.subr.bf16.mxu1 %v2867_v39 }
 0x56e   : > { %2366 = vmatmul.mubr.msk.f32.vlgmr.msra.gmra.mrb[4].mxu0 %vm1335_vm6, %v1378_v58 }
 0x56f   : > { %v2631_v59 = vpop.eup %2630  ;;  %2383 = vmatprep.mubr.msk.f32.mxu0 %vm2868_vm2, %v2869_v42  ;;  %2468 = vmatpush3.bf16.msra.mxu0 %v2467_v1 }
 0x570   : > { %v1379_v60 = vmul.f32 %v2631_v59, %v2623_v35  ;;  %2469 = vmatprep.subr.bf16.mxu0 %v2867_v39 }
 0x572   : > { %2373 = vmatmul.mubr.msk.f32.vlgmr.msra.gmra.mrb[10].mxu1 %vm1335_vm6, %v1379_v60 }
 0x573   : > { %2394 = vmatprep.mubr.msk.f32.mxu1 %vm2868_vm2, %v2869_v42  ;;  %2471 = vmatpush3.bf16.msra.mxu0 %v2470_v4 }
 0x574   : > { %2478 = vmatprep.subr.bf16.mxu0 %v2867_v39 }
 0x5cb   : > { %v1457_v61 = vpop.f32.mrb[6].mxu1 }
 0x5cc   : > { %v2353_v62 = vpop.f32.mrb[7].mxu1 }
 0x63d   : > { %v1530_v5 = vpop.f32.mrb[8].mxu1 }
 0x63e   : > { %1681 = vrot.lane.b32.xlu0 %v1530_v5, %s2873_s19  ;;  %v2360_v6 = vpop.f32.mrb[9].mxu1 }
 0x641   : > { %v1603_v7 = vpop.f32.mrb[4].mxu0 }
 0x642   : > { %1685 = vrot.lane.b32.xlu1 %v1603_v7, %s2874_s26  ;;  %v2367_v8 = vpop.f32.mrb[5].mxu0  ;;  %s3504_s26 = sld [smem:[#allocation35_spill]] }
 0x645   : > { %v1676_v9 = vpop.f32.mrb[10].mxu1 }
 0x646   : > { %v2374_v10 = vpop.f32.mrb[11].mxu1  ;;  %1689 = vrot.lane.b32.xlu1 %v1676_v9, %s2875_s16  ;;  %s3500_s16 = sld [smem:[#allocation31_spill]] }
 0x64c   : > { %v2214_v56 = vld [vmem:[%s3500_s16] ss:$0 sm:$0xff]  ;;  %s2222_s16 = sshll.u32 %s2032_s24, 7  ;;  %s2750_s24 = scalar_lea.vmem %s3370_s23, 128 }
 0x64d   : > { %s3368_s3 = scalar_lea.hbm %s3505_s0, %s2222_s16  ;;  %p2751_p12 = scmp.ne.s32.totalorder %s3370_s23, %s2750_s24 }
 0x64f   : > { %p2752_p4 = pnand %p2751_p12, %p3508_p1 }
 0x651   : > { %p2753_p5 = pneg %p2752_p4 }
 0x6b0   : > { %v1682_v11 = vpop.permute.xlu0 %1681 }
 0x6b1   : > { %v1692_v13 = vsel %vm1022_vm4, %v1457_v61, %v1682_v11 }
 0x6b4   : > { %v1686_v12 = vpop.permute.xlu1 %1685 }
 0x6b5   : > { %v1693_v14 = vsel %vm1335_vm6, %v1692_v13, %v1686_v12 }
 0x6b8   : > { %v1690_v15 = vpop.permute.xlu1 %1689 }
 0x6b9   : > { %v1695_v16 = vsel %vm1694_vm7, %v1693_v14, %v1690_v15  ;;  %v2218_v15 = vld [vmem:[%s3503_s1] ss:$0 sm:$0xff]  ;;  %s2756_s1 = scalar_lea.vmem %s2755_s27, 256 }
 0x6ba   : > { %2384 = vmatmul.mubr.msk.f32.vlgmr.msra.gmra.mrb[6].mxu0 %vm932_vm3, %v1695_v16  ;;  %p2758_p7 = scmp.lt.s32.totalorder %s2756_s1, %s2750_s24 }
 0x6bb   : > { %2413 = vmatprep.mubr.msk.f32.mxu0 %vm2868_vm2, %v2869_v42  ;;  %v1811_v42 = vld [vmem:[#allocation10] sm:$0xff]  ;;  %2480 = vmatpush3.bf16.msra.mxu0 %v2479_v46 }
 0x6bc   : > { %v2473_v29 = vpack.c.bf16 %v1812_v28, %v1811_v42  ;;  %2481 = vmatprep.subr.bf16.mxu0 %v2867_v39  ;;  %p2759_p9 = por %p2758_p7, %p2757_p6 }
 0x6be   : > { %2474 = vmatpush3.bf16.msra.mxu1 %v2473_v29  ;;  %p2760_p11 = pnand %p2759_p9, %p2753_p5 }
 0x6bf   : > { %2475 = vmatprep.subr.bf16.mxu1 %v2867_v39  ;;  %2483 = vmatpush3.bf16.msra.mxu0 %v2482_v49 }
 0x6c0   : > { %2484 = vmatprep.subr.bf16.mxu0 %v2867_v39 }
 0x6c2   : > { %2477 = vmatpush3.bf16.msra.mxu1 %v2476_v32 }
 0x6c3   : > { %2486 = vmatpush3.bf16.msra.mxu0 %v2485_v52 }
 0x6c4   : > { %2487 = vmatprep.subr.bf16.mxu0 %v2867_v39 }
 0x6c7   : > { %2489 = vmatpush3.bf16.msra.mxu0 %v2488_v55 }
 0x78d   : > { %v1776_v18 = vpop.f32.mrb[6].mxu0 }
 0x78e   : > { %v1777_v19 = vadd.f32 %v2210_v17, %v1776_v18  ;;  %v2385_v20 = vpop.f32.mrb[7].mxu0  ;;  %v2219_v17 = vld [vmem:[%s3504_s26] ss:$0 sm:$0xff] }
 0x790   : > { %v1780_v21 = vadd.f32 %v1777_v19, %v3235_v44 }
 0x792   : > { %v1783_v22 = vsel %vm932_vm3, %v1780_v21, 0.0 }
 0x793   : > { %1784 = vadd.xlane.f32.xlu0 %v1783_v22 }
 0x820   : > { %v1785_v23 = vpop.xlane.xlu0 %1784 }
 0x821   : > { %v1787_v24 = vmul.f32 0.03125, %v1785_v23 }
 0x823   : > { %v1788_v25 = vsub.f32 %v1780_v21, %v1787_v24 }
 0x825   : > { %v1789_v26 = vmul.f32 %v1788_v25, %v1788_v25 }
 0x827   : > { %v1790_v27 = vsel %vm932_vm3, %v1789_v26, 0.0 }
 0x828   : > { %1791 = vadd.xlane.f32.xlu1 %v1790_v27 }
 0x8b5   : > { %v1792_v44 = vpop.xlane.xlu1 %1791 }
 0x8b6   : > { %v1793_v33 = vmul.f32 0.03125, %v1792_v44 }
 0x8b8   : > { %v1794_v34 = vadd.f32 1e-05, %v1793_v33 }
 0x8ba   : > { %2632 = vrsqrt.f32 %v1794_v34 }
 0x8c4   : > { %v2633_v35 = vpop.eup %2632 }
 0x8c5   : > { %v1796_v37 = vmul.f32 %v2633_v35, %v1788_v25 }
 0x8c7   : > { %v1803_v40 = vmul.f32 %v2212_v36, %v1796_v37 }
 0x8c9   : > { %v1810_v41 = vadd.f32 %v2213_v38, %v1803_v40 }
 0x8cb   : > { %2395 = vmatmul.mubr.msk.f32.vlgmr.msra.gmra.mrb[12].mxu1 %vm932_vm3, %v1810_v41 }
 0x99e   : > { %v1891_v57 = vpop.f32.mrb[12].mxu1 }
 0x99f   : > { %v1892_v58 = vadd.f32 %v2214_v56, %v1891_v57  ;;  %v2396_v59 = vpop.f32.mrb[13].mxu1 }
 0x9a1   : > { %v1896_v60 = vmul.f32 0.70710677, %v1892_v58  ;;  %v1895_v61 = vmul.f32 0.5, %v1892_v58 }
 0x9a3   : > { %2634 = verf.f32 %v1896_v60 }
 0x9ad   : > { %v2635_v39 = vpop.eup %2634 }
 0x9ae   : > { %v1898_v62 = vadd.f32 1.0, %v2635_v39 }
 0x9b0   : > { %v1899_v63 = vmul.f32 %v1898_v62, %v1895_v61 }
 0x9b2   : > { %2414 = vmatmul.mubr.msk.f32.vlgmr.msra.gmra.mrb[8].mxu0 %vm1915_vm8, %v1899_v63 }
 0xa85   : > { %v1985_v1 = vpop.f32.mrb[8].mxu0 }
 0xa86   : > { %v1986_v2 = vadd.f32 %v2216_v0, %v1985_v1  ;;  %v2415_v3 = vpop.f32.mrb[9].mxu0 }
 0xa88   : > { %v1989_v4 = vadd.f32 %v1986_v2, %v1810_v41 }
 0xa8a   : > { %v1992_v5 = vsel %vm932_vm3, %v1989_v4, 0.0 }
 0xa8b   : > { %1993 = vadd.xlane.f32.xlu0 %v1992_v5 }
 0xb18   : > { %v1994_v6 = vpop.xlane.xlu0 %1993 }
 0xb19   : > { %v1995_v7 = vmul.f32 0.03125, %v1994_v6 }
 0xb1b   : > { %v1996_v8 = vsub.f32 %v1989_v4, %v1995_v7 }
 0xb1d   : > { %v1997_v9 = vmul.f32 %v1996_v8, %v1996_v8 }
 0xb1f   : > { %v1998_v10 = vsel %vm932_vm3, %v1997_v9, 0.0 }
 0xb20   : > { %1999 = vadd.xlane.f32.xlu0 %v1998_v10 }
 0xbad   : > { %v2000_v11 = vpop.xlane.xlu0 %1999 }
 0xbae   : > { %v2001_v12 = vmul.f32 0.03125, %v2000_v11 }
 0xbb0   : > { %v2002_v13 = vadd.f32 1e-05, %v2001_v12 }
 0xbb2   : > { %2636 = vrsqrt.f32 %v2002_v13 }
 0xbbc   : > { %v2637_v14 = vpop.eup %2636 }
 0xbbd   : > { %v2004_v16 = vmul.f32 %v2637_v14, %v1996_v8 }
 0xbbf   : > { %v2011_v18 = vmul.f32 %v2218_v15, %v2004_v16 }
 0xbc1   : > { %v2018_v19 = vadd.f32 %v2219_v17, %v2011_v18 }
 0xbc3   : > { %2019 = vst.msk [vmem:[%s664_s29] sm:$0xff] %vm932_vm3, %v2018_v19 }
 0xbc4   : > { %2763 = shalt.err (!%p2760_p11)
}
 0xbc5   : > { %s2764_s2 = scalar_lea.hbm %s3368_s3, 128  ;;  %s2768_s19 = scalar_lea.hbm %s3506_s18, 512 }
 0xbc6   : > { %p2765_p13 = scmp.ne.s32.totalorder %s3368_s3, %s2764_s2  ;;  %p2769_p0 = scmp.lt.u32.totalorder %s3368_s3, %s3506_s18 }
 0xbc7   : > { %p2770_p8 = scmp.lt.u32.totalorder %s2768_s19, %s2764_s2  ;;  %p2772_p12 = scmp.lt.u32.totalorder %s2764_s2, %s3368_s3 }
 0xbc8   : > { %p2766_p3 = pnand %p2765_p13, %p3508_p1 }
 0xbc9   : > { %p2771_p10 = por %p2770_p8, %p2769_p0 }
 0xbca   : > { %p2767_p2 = pneg %p2766_p3 }
 0xbcb   : > { %p2773_p4 = por %p2772_p12, %p2771_p10 }
 0xbcd   : > { %p2774_p5 = pnand %p2773_p4, %p2767_p2 }
 0xbcf   : > { %2777 = shalt.err (!%p2774_p5)
}
 0xbd0   : > { %2506 = dma.vmem_to_hbm [thread:$0]  (%p3508_p1), %s3370_s23, 128, %s3368_s3, %s2021_s17  }
 0xbd1 PF: > { %s3509_s22 = sld [smem:[#allocation21_spill]]  ;;  %s3510_s25 = sld [smem:[#allocation17_spill]] }
 0xbd2   : > { %s3511_s0 = sld [smem:[#allocation25_spill]] }
 0xbd7   : > { %p2533_p6 = scmp.ge.s32.totalorder %s3509_s22, 2  ;;  %s2048_s30 = sand.u32 1, %s3510_s25  }
 0xbd8   : > { %p3512_p7 = scmp.ne.s32.totalorder %s3511_s0, 0  ;;  %s2049_s24 = scalar_lea.sflag [#allocation6], %s2048_s30 }
 0xbda   : > { %p2522_p9 = pnand %p2533_p6, %p3512_p7 }
 0xbdc   : > { %2823 = dma.done.wait (!%p2522_p9), %s2049_s24, 128  }
 0xbdd   : > { %2825 = vsyncadd (!%p2522_p9), %s2049_s24, 4294967168  ;;  %s34_s20 = sadd.s32 1, %s3509_s22   ;;  %s3513_s1 = sld [smem:[#allocation18_spill]] }
 0xbde   : > { %p31_p11 = scmp.ge.s32.totalorder %s34_s20, 6   ;;  %s3514_s29 = sld [smem:[#allocation26_spill]] }
 0xbdf   : > { %s3515_s30 = sld [smem:[#allocation19_spill]]  ;;  %s3516_s0 = sld [smem:[#allocation20_spill]] }
 0xbe0   : > { %s3517_s19 = sld [smem:[#allocation22_spill]]  ;;  %s3518_s3 = sld [smem:[#allocation24_spill]] }
 0xbe1   : > { %s3519_s27 = smov %s2832_s28  ;;  %33 = sbr.rel (!%p31_p11) target bundleno = 19 (0x13), region = 151 }
 0xbe3   : > { %s3520_s28 = smov %s3513_s1 }
 0xbe6   : > { %s3521_s1 = smov %s3518_s3 }
 0xbe8   :  { %2054 = vsyncpa [#allocation5], 1 }
 0xbe9   :  { %2056 = vsyncpa [#allocation5 + $0x1], 1 }
 0xbea   :  { %2057 = vsyncpa [#allocation8], 1 }
 0xbeb   :  { %2058 = vsyncpa [#allocation11], 1 }
 0xbec   :  { %2059 = vsyncpa [#allocation6], 1 }
 0xbed   :  { %2061 = vsyncpa [#allocation6 + $0x1], 1 }

</bundles_post_ra>
